<compile_context>
chip_gen: v7x
topology: tpu7x:2x2x1
jax: 0.10.0
libtpu: 0.0.40
codegen_flags: <defaults>
</compile_context>

<pallas_src>
import jax
import jax.numpy as jnp
from jax.experimental import pallas as pl
from jax.experimental.pallas import tpu as pltpu

HGRU = 2  # Seq2Seq hidden_size=2 (as in the module: Seq2Seq(..., hidden_size=2))

PARAM_ORDER = [
    "w_emb", "b_emb",
    "e_wih0", "e_whh0", "e_bih0", "e_bhh0",
    "e_wih1", "e_whh1", "e_bih1", "e_bhh1",
    "d_wih0", "d_whh0", "d_bih0", "d_bhh0",
    "d_wih1", "d_whh1", "d_bih1", "d_bhh1",
    "w_lin", "b_lin",
]


def _sigmoid(x):
    # sigmoid(x) == 0.5*tanh(0.5*x) + 0.5 : one EUP tanh, no exact f32 divide.
    return 0.5 * jnp.tanh(0.5 * x) + 0.5


def rnn_baseline_kernel(x_ref, wc_ref, w2_ref, b_ref, out_ref):
    # x_ref  : (F, T*N)   raw inputs, batch-on-lanes (column = t*N + n)
    # wc_ref : (8, F)     composed (e_wih0 @ w_emb), rows 0:6 valid
    # w2_ref : (8, 6, 2)  stacked HGRU-input weights (+ padded Linear head)
    # b_ref  : (9, 6, 1)  stacked bias columns (+ composed layer-0 bias, head)
    # out_ref: (2*P, N)   predicted locations, batch-on-lanes
    P2, N = out_ref.shape
    P = P2 // 2
    TN = x_ref.shape[1]
    T = TN // N

    x = x_ref[...]

    # ---- hoisted non-recurrent projection: embedding + encoder layer-0 wih ----
    # gi0 for all T steps in one matmul, off the serial dependency chain.
    gi0_slab = jnp.dot(wc_ref[...], x,
                       preferred_element_type=jnp.float32)[0:3 * HGRU, :]
    gi0_slab = gi0_slab + b_ref[0]                       # (6, T*N)

    # ---- load weights once; pre-broadcast columns (hoisted out of loops) ----
    def cols(w):                       # w: (R, 2) -> two (R, N) columns
        R = w.shape[0]
        return (jnp.broadcast_to(w[:, 0:1], (R, N)),
                jnp.broadcast_to(w[:, 1:2], (R, N)))

    def bias(i, rows=3 * HGRU):        # (rows, N) lane-broadcast bias
        return jnp.broadcast_to(b_ref[i][0:rows, :], (rows, N))

    e_whh0 = cols(w2_ref[0]); e_bhh0 = bias(1)
    e_wih1 = cols(w2_ref[1]); e_bih1 = bias(2)
    e_whh1 = cols(w2_ref[2]); e_bhh1 = bias(3)
    d_wih0 = cols(w2_ref[3]); d_bih0 = bias(4)
    d_whh0 = cols(w2_ref[4]); d_bhh0 = bias(5)
    d_wih1 = cols(w2_ref[5]); d_bih1 = bias(6)
    d_whh1 = cols(w2_ref[6]); d_bhh1 = bias(7)
    w_lin = cols(w2_ref[7][0:2, :]);   b_lin = bias(8, rows=2)

    def fma2(wc, v):
        # W @ v with 2-wide contraction: two VPU FMAs, no XLU reduce.
        return wc[0] * v[0:1, :] + wc[1] * v[1:2, :]

    def gru_from_gates(gi, gh, h):
        # PyTorch GRU gate order (r, z, n); r and z fused into one activation.
        rz = _sigmoid(gi[0:2 * HGRU] + gh[0:2 * HGRU])
        r, z = rz[0:HGRU], rz[HGRU:2 * HGRU]
        n = jnp.tanh(gi[2 * HGRU:] + r * gh[2 * HGRU:])
        return n + z * (h - n)

    def gru_cell(v, h, wih, whh, bih, bhh):
        gi = fma2(wih, v) + bih
        gh = fma2(whh, h) + bhh
        return gru_from_gates(gi, gh, h)

    # ---- encoder: 2-layer GRU over T steps (only h-terms remain per step) ----
    h0 = jnp.zeros((HGRU, N), jnp.float32)
    h1 = jnp.zeros((HGRU, N), jnp.float32)
    for t in range(T):
        gi0 = gi0_slab[:, t * N:(t + 1) * N]             # precomputed
        gh0 = fma2(e_whh0, h0) + e_bhh0
        h0 = gru_from_gates(gi0, gh0, h0)
        h1 = gru_cell(h0, h1, e_wih1, e_whh1, e_bih1, e_bhh1)

    # ---- decoder: residual location rollout for P steps ----------------------
    dec_in = x[0:2, (T - 1) * N:T * N]                   # last_location.T (2, N)
    d0, d1 = h0, h1
    outs = []
    for _ in range(P):
        d0 = gru_cell(dec_in, d0, d_wih0, d_whh0, d_bih0, d_bhh0)
        d1 = gru_cell(d0, d1, d_wih1, d_whh1, d_bih1, d_bhh1)
        now = fma2(w_lin, d1) + b_lin + dec_in
        outs.append(now)
        dec_in = now

    out_ref[...] = jnp.concatenate(outs, axis=0)         # one (2*P, N) store


def rnn_baseline_forward(inputs, params, pred_length=3):
    """Pallas wrapper. inputs: (N, T, F) float32. Returns (N, pred_length, 2)."""
    N, T, F = inputs.shape
    p = params

    # Pre-compose embedding Linear with encoder layer-0 input projection:
    #   gi0 = (x @ w_emb.T + b_emb) @ e_wih0.T + e_bih0
    #       = x @ (e_wih0 @ w_emb).T + (b_emb @ e_wih0.T + e_bih0)
    wc = p["e_wih0"] @ p["w_emb"]                                    # (6, F)
    wc8 = jnp.pad(wc, ((0, 8 - wc.shape[0]), (0, 0)))                # (8, F)
    b0c = (p["b_emb"] @ p["e_wih0"].T + p["e_bih0"]).T               # (6, 1)

    def col(b):                    # (1, K) -> (K, 1)
        return b.T

    def pad_rows(a, rows=3 * HGRU):
        return jnp.pad(a, ((0, rows - a.shape[0]), (0, 0)))

    w2 = jnp.stack([p["e_whh0"], p["e_wih1"], p["e_whh1"],
                    p["d_wih0"], p["d_whh0"], p["d_wih1"], p["d_whh1"],
                    pad_rows(p["w_lin"])], axis=0)                   # (8, 6, 2)
    bs = jnp.stack([b0c, col(p["e_bhh0"]), col(p["e_bih1"]), col(p["e_bhh1"]),
                    col(p["d_bih0"]), col(p["d_bhh0"]), col(p["d_bih1"]),
                    col(p["d_bhh1"]), pad_rows(col(p["b_lin"]))], axis=0)  # (9,6,1)

    # batch-on-lanes input slab: column index = t*N + n
    xs = jnp.transpose(inputs, (2, 1, 0)).reshape(F, T * N)          # (F, T*N)

    vmem = pl.BlockSpec(memory_space=pltpu.MemorySpace.VMEM)
    out = pl.pallas_call(
        rnn_baseline_kernel,
        out_shape=jax.ShapeDtypeStruct((2 * pred_length, N), jnp.float32),
        in_specs=[vmem] * 4,
        out_specs=vmem,
    )(xs, wc8, w2, bs)
    # (2*P, N) -> (N, P, 2)
    return out.reshape(pred_length, 2, N).transpose(2, 0, 1)
    # TODO(synk): if batch grows large on v7x, add a grid over batch tiles with
    # dimension_semantics=("parallel",) to use the second TensorCore.


def init_params(key, input_dim, hidden_dim):
    ks = iter(jax.random.split(key, 32))

    def nrm(shape):
        return (0.1 * jax.random.normal(next(ks), shape)).astype(jnp.float32)

    p = {}
    # embedding_h = nn.Linear(input_dim, hidden_dim)
    p["w_emb"] = nrm((hidden_dim, input_dim))
    p["b_emb"] = nrm((1, hidden_dim))
    # encoder GRU: input hidden_dim -> hidden HGRU, 2 layers
    p["e_wih0"] = nrm((3 * HGRU, hidden_dim))
    p["e_whh0"] = nrm((3 * HGRU, HGRU))
    p["e_bih0"] = nrm((1, 3 * HGRU))
    p["e_bhh0"] = nrm((1, 3 * HGRU))
    p["e_wih1"] = nrm((3 * HGRU, HGRU))
    p["e_whh1"] = nrm((3 * HGRU, HGRU))
    p["e_bih1"] = nrm((1, 3 * HGRU))
    p["e_bhh1"] = nrm((1, 3 * HGRU))
    # decoder GRU: input 2 -> hidden HGRU, 2 layers
    p["d_wih0"] = nrm((3 * HGRU, 2))
    p["d_whh0"] = nrm((3 * HGRU, HGRU))
    p["d_bih0"] = nrm((1, 3 * HGRU))
    p["d_bhh0"] = nrm((1, 3 * HGRU))
    p["d_wih1"] = nrm((3 * HGRU, HGRU))
    p["d_whh1"] = nrm((3 * HGRU, HGRU))
    p["d_bih1"] = nrm((1, 3 * HGRU))
    p["d_bhh1"] = nrm((1, 3 * HGRU))
    # decoder Linear(hidden -> 2)
    p["w_lin"] = nrm((2, HGRU))
    p["b_lin"] = nrm((1, 2))
    return p


def reference_forward(inputs, p, pred_length=3):
    """Pure-JAX reference mirroring the PyTorch semantics."""
    N, T, F = inputs.shape

    def gru(x, h, wih, whh, bih, bhh):
        gi = x @ wih.T + bih
        gh = h @ whh.T + bhh
        r = jax.nn.sigmoid(gi[:, 0:HGRU] + gh[:, 0:HGRU])
        z = jax.nn.sigmoid(gi[:, HGRU:2 * HGRU] + gh[:, HGRU:2 * HGRU])
        n = jnp.tanh(gi[:, 2 * HGRU:] + r * gh[:, 2 * HGRU:])
        return (1.0 - z) * n + z * h

    h0 = jnp.zeros((N, HGRU), jnp.float32)
    h1 = jnp.zeros((N, HGRU), jnp.float32)
    for t in range(T):
        ht = inputs[:, t, :] @ p["w_emb"].T + p["b_emb"]
        h0 = gru(ht, h0, p["e_wih0"], p["e_whh0"], p["e_bih0"], p["e_bhh0"])
        h1 = gru(h0, h1, p["e_wih1"], p["e_whh1"], p["e_bih1"], p["e_bhh1"])

    dec_in = inputs[:, T - 1, 0:2]
    d0, d1 = h0, h1
    outs = []
    for _ in range(pred_length):
        d0 = gru(dec_in, d0, p["d_wih0"], p["d_whh0"], p["d_bih0"], p["d_bhh0"])
        d1 = gru(d0, d1, p["d_wih1"], p["d_whh1"], p["d_bih1"], p["d_bhh1"])
        now = d1 @ p["w_lin"].T + p["b_lin"] + dec_in
        outs.append(now)
        dec_in = now
    return jnp.stack(outs, axis=1)


if __name__ == "__main__":
    # Shapes consistent with the module's forward:
    #   inputs: (batch=2, seq=8, input_dim=16), hidden_dim=32, pred_length=3
    batch, seq, input_dim, hidden_dim, pred_length = 2, 8, 16, 32, 3

    key = jax.random.PRNGKey(0)
    k_x, k_p = jax.random.split(key)
    inputs = jax.random.normal(k_x, (batch, seq, input_dim), dtype=jnp.float32)
    params = init_params(k_p, input_dim, hidden_dim)

    out = rnn_baseline_forward(inputs, params, pred_length=pred_length)
    out = jax.block_until_ready(out)

    ref = reference_forward(inputs, params, pred_length=pred_length)
    assert out.shape == (batch, pred_length, 2), out.shape
    assert jnp.allclose(out, ref, atol=1e-4, rtol=1e-4), (
        f"max abs diff {jnp.max(jnp.abs(out - ref))}")

    print("KERNEL_OK")
</pallas_src>

<mosaic_0001>
module attributes {stable_mosaic.version = 11 : i64} {
  func.func @rnn_baseline_kernel(%arg0: memref<16x16xf32, #tpu.memory_space<vmem>>, %arg1: memref<8x16xf32, #tpu.memory_space<vmem>>, %arg2: memref<8x6x2xf32, #tpu.memory_space<vmem>>, %arg3: memref<9x6x1xf32, #tpu.memory_space<vmem>>, %arg4: memref<6x2xf32, #tpu.memory_space<vmem>>) attributes {dimension_semantics = [], scalar_prefetch = 0 : i64, scratch_operands = 0 : i64, tpu.core_type = #tpu.core_type<tc>} {
    %c0 = arith.constant 0 : index
    %c0_0 = arith.constant 0 : index
    %0 = vector.load %arg0[%c0, %c0_0] : memref<16x16xf32, #tpu.memory_space<vmem>>, vector<16x16xf32>
    %c0_1 = arith.constant 0 : index
    %c0_2 = arith.constant 0 : index
    %1 = vector.load %arg1[%c0_1, %c0_2] : memref<8x16xf32, #tpu.memory_space<vmem>>, vector<8x16xf32>
    %cst = arith.constant dense<0.000000e+00> : vector<8x16xf32>
    %2 = tpu.matmul %1, %0, %cst {dimension_numbers = #tpu.dot_dimension_numbers<[1], [0], [0], [1], [0, 0, 1, 1], [], []>} : vector<8x16xf32>, vector<16x16xf32>, vector<8x16xf32> -> vector<8x16xf32>
    %3 = vector.extract_strided_slice %2 {offsets = [0, 0], sizes = [6, 16], strides = [1, 1]} : vector<8x16xf32> to vector<6x16xf32>
    %c0_3 = arith.constant 0 : index
    %c0_4 = arith.constant 0 : index
    %c0_5 = arith.constant 0 : index
    %4 = vector.load %arg3[%c0_3, %c0_4, %c0_5] : memref<9x6x1xf32, #tpu.memory_space<vmem>>, vector<1x6x1xf32>
    %5 = vector.shape_cast %4 : vector<1x6x1xf32> to vector<6x1xf32>
    %6 = vector.broadcast %5 : vector<6x1xf32> to vector<6x16xf32>
    %7 = arith.addf %3, %6 : vector<6x16xf32>
    %c0_6 = arith.constant 0 : index
    %c0_7 = arith.constant 0 : index
    %c0_8 = arith.constant 0 : index
    %8 = vector.load %arg2[%c0_6, %c0_7, %c0_8] : memref<8x6x2xf32, #tpu.memory_space<vmem>>, vector<1x6x2xf32>
    %9 = vector.shape_cast %8 : vector<1x6x2xf32> to vector<6x2xf32>
    %10 = vector.extract_strided_slice %9 {offsets = [0, 0], sizes = [6, 1], strides = [1, 1]} : vector<6x2xf32> to vector<6x1xf32>
    %11 = vector.shape_cast %10 : vector<6x1xf32> to vector<6x1xf32>
    %12 = vector.broadcast %11 : vector<6x1xf32> to vector<6x2xf32>
    %13 = vector.extract_strided_slice %9 {offsets = [0, 1], sizes = [6, 1], strides = [1, 1]} : vector<6x2xf32> to vector<6x1xf32>
    %14 = vector.shape_cast %13 : vector<6x1xf32> to vector<6x1xf32>
    %15 = vector.broadcast %14 : vector<6x1xf32> to vector<6x2xf32>
    %c1 = arith.constant 1 : index
    %c0_9 = arith.constant 0 : index
    %c0_10 = arith.constant 0 : index
    %16 = vector.load %arg3[%c1, %c0_9, %c0_10] : memref<9x6x1xf32, #tpu.memory_space<vmem>>, vector<1x6x1xf32>
    %17 = vector.shape_cast %16 : vector<1x6x1xf32> to vector<6x1xf32>
    %18 = vector.shape_cast %17 : vector<6x1xf32> to vector<6x1xf32>
    %19 = vector.broadcast %18 : vector<6x1xf32> to vector<6x2xf32>
    %c1_11 = arith.constant 1 : index
    %c0_12 = arith.constant 0 : index
    %c0_13 = arith.constant 0 : index
    %20 = vector.load %arg2[%c1_11, %c0_12, %c0_13] : memref<8x6x2xf32, #tpu.memory_space<vmem>>, vector<1x6x2xf32>
    %21 = vector.shape_cast %20 : vector<1x6x2xf32> to vector<6x2xf32>
    %22 = vector.extract_strided_slice %21 {offsets = [0, 0], sizes = [6, 1], strides = [1, 1]} : vector<6x2xf32> to vector<6x1xf32>
    %23 = vector.shape_cast %22 : vector<6x1xf32> to vector<6x1xf32>
    %24 = vector.broadcast %23 : vector<6x1xf32> to vector<6x2xf32>
    %25 = vector.extract_strided_slice %21 {offsets = [0, 1], sizes = [6, 1], strides = [1, 1]} : vector<6x2xf32> to vector<6x1xf32>
    %26 = vector.shape_cast %25 : vector<6x1xf32> to vector<6x1xf32>
    %27 = vector.broadcast %26 : vector<6x1xf32> to vector<6x2xf32>
    %c2 = arith.constant 2 : index
    %c0_14 = arith.constant 0 : index
    %c0_15 = arith.constant 0 : index
    %28 = vector.load %arg3[%c2, %c0_14, %c0_15] : memref<9x6x1xf32, #tpu.memory_space<vmem>>, vector<1x6x1xf32>
    %29 = vector.shape_cast %28 : vector<1x6x1xf32> to vector<6x1xf32>
    %30 = vector.shape_cast %29 : vector<6x1xf32> to vector<6x1xf32>
    %31 = vector.broadcast %30 : vector<6x1xf32> to vector<6x2xf32>
    %c2_16 = arith.constant 2 : index
    %c0_17 = arith.constant 0 : index
    %c0_18 = arith.constant 0 : index
    %32 = vector.load %arg2[%c2_16, %c0_17, %c0_18] : memref<8x6x2xf32, #tpu.memory_space<vmem>>, vector<1x6x2xf32>
    %33 = vector.shape_cast %32 : vector<1x6x2xf32> to vector<6x2xf32>
    %34 = vector.extract_strided_slice %33 {offsets = [0, 0], sizes = [6, 1], strides = [1, 1]} : vector<6x2xf32> to vector<6x1xf32>
    %35 = vector.shape_cast %34 : vector<6x1xf32> to vector<6x1xf32>
    %36 = vector.broadcast %35 : vector<6x1xf32> to vector<6x2xf32>
    %37 = vector.extract_strided_slice %33 {offsets = [0, 1], sizes = [6, 1], strides = [1, 1]} : vector<6x2xf32> to vector<6x1xf32>
    %38 = vector.shape_cast %37 : vector<6x1xf32> to vector<6x1xf32>
    %39 = vector.broadcast %38 : vector<6x1xf32> to vector<6x2xf32>
    %c3 = arith.constant 3 : index
    %c0_19 = arith.constant 0 : index
    %c0_20 = arith.constant 0 : index
    %40 = vector.load %arg3[%c3, %c0_19, %c0_20] : memref<9x6x1xf32, #tpu.memory_space<vmem>>, vector<1x6x1xf32>
    %41 = vector.shape_cast %40 : vector<1x6x1xf32> to vector<6x1xf32>
    %42 = vector.shape_cast %41 : vector<6x1xf32> to vector<6x1xf32>
    %43 = vector.broadcast %42 : vector<6x1xf32> to vector<6x2xf32>
    %c3_21 = arith.constant 3 : index
    %c0_22 = arith.constant 0 : index
    %c0_23 = arith.constant 0 : index
    %44 = vector.load %arg2[%c3_21, %c0_22, %c0_23] : memref<8x6x2xf32, #tpu.memory_space<vmem>>, vector<1x6x2xf32>
    %45 = vector.shape_cast %44 : vector<1x6x2xf32> to vector<6x2xf32>
    %46 = vector.extract_strided_slice %45 {offsets = [0, 0], sizes = [6, 1], strides = [1, 1]} : vector<6x2xf32> to vector<6x1xf32>
    %47 = vector.shape_cast %46 : vector<6x1xf32> to vector<6x1xf32>
    %48 = vector.broadcast %47 : vector<6x1xf32> to vector<6x2xf32>
    %49 = vector.extract_strided_slice %45 {offsets = [0, 1], sizes = [6, 1], strides = [1, 1]} : vector<6x2xf32> to vector<6x1xf32>
    %50 = vector.shape_cast %49 : vector<6x1xf32> to vector<6x1xf32>
    %51 = vector.broadcast %50 : vector<6x1xf32> to vector<6x2xf32>
    %c4 = arith.constant 4 : index
    %c0_24 = arith.constant 0 : index
    %c0_25 = arith.constant 0 : index
    %52 = vector.load %arg3[%c4, %c0_24, %c0_25] : memref<9x6x1xf32, #tpu.memory_space<vmem>>, vector<1x6x1xf32>
    %53 = vector.shape_cast %52 : vector<1x6x1xf32> to vector<6x1xf32>
    %54 = vector.shape_cast %53 : vector<6x1xf32> to vector<6x1xf32>
    %55 = vector.broadcast %54 : vector<6x1xf32> to vector<6x2xf32>
    %c4_26 = arith.constant 4 : index
    %c0_27 = arith.constant 0 : index
    %c0_28 = arith.constant 0 : index
    %56 = vector.load %arg2[%c4_26, %c0_27, %c0_28] : memref<8x6x2xf32, #tpu.memory_space<vmem>>, vector<1x6x2xf32>
    %57 = vector.shape_cast %56 : vector<1x6x2xf32> to vector<6x2xf32>
    %58 = vector.extract_strided_slice %57 {offsets = [0, 0], sizes = [6, 1], strides = [1, 1]} : vector<6x2xf32> to vector<6x1xf32>
    %59 = vector.shape_cast %58 : vector<6x1xf32> to vector<6x1xf32>
    %60 = vector.broadcast %59 : vector<6x1xf32> to vector<6x2xf32>
    %61 = vector.extract_strided_slice %57 {offsets = [0, 1], sizes = [6, 1], strides = [1, 1]} : vector<6x2xf32> to vector<6x1xf32>
    %62 = vector.shape_cast %61 : vector<6x1xf32> to vector<6x1xf32>
    %63 = vector.broadcast %62 : vector<6x1xf32> to vector<6x2xf32>
    %c5 = arith.constant 5 : index
    %c0_29 = arith.constant 0 : index
    %c0_30 = arith.constant 0 : index
    %64 = vector.load %arg3[%c5, %c0_29, %c0_30] : memref<9x6x1xf32, #tpu.memory_space<vmem>>, vector<1x6x1xf32>
    %65 = vector.shape_cast %64 : vector<1x6x1xf32> to vector<6x1xf32>
    %66 = vector.shape_cast %65 : vector<6x1xf32> to vector<6x1xf32>
    %67 = vector.broadcast %66 : vector<6x1xf32> to vector<6x2xf32>
    %c5_31 = arith.constant 5 : index
    %c0_32 = arith.constant 0 : index
    %c0_33 = arith.constant 0 : index
    %68 = vector.load %arg2[%c5_31, %c0_32, %c0_33] : memref<8x6x2xf32, #tpu.memory_space<vmem>>, vector<1x6x2xf32>
    %69 = vector.shape_cast %68 : vector<1x6x2xf32> to vector<6x2xf32>
    %70 = vector.extract_strided_slice %69 {offsets = [0, 0], sizes = [6, 1], strides = [1, 1]} : vector<6x2xf32> to vector<6x1xf32>
    %71 = vector.shape_cast %70 : vector<6x1xf32> to vector<6x1xf32>
    %72 = vector.broadcast %71 : vector<6x1xf32> to vector<6x2xf32>
    %73 = vector.extract_strided_slice %69 {offsets = [0, 1], sizes = [6, 1], strides = [1, 1]} : vector<6x2xf32> to vector<6x1xf32>
    %74 = vector.shape_cast %73 : vector<6x1xf32> to vector<6x1xf32>
    %75 = vector.broadcast %74 : vector<6x1xf32> to vector<6x2xf32>
    %c6 = arith.constant 6 : index
    %c0_34 = arith.constant 0 : index
    %c0_35 = arith.constant 0 : index
    %76 = vector.load %arg3[%c6, %c0_34, %c0_35] : memref<9x6x1xf32, #tpu.memory_space<vmem>>, vector<1x6x1xf32>
    %77 = vector.shape_cast %76 : vector<1x6x1xf32> to vector<6x1xf32>
    %78 = vector.shape_cast %77 : vector<6x1xf32> to vector<6x1xf32>
    %79 = vector.broadcast %78 : vector<6x1xf32> to vector<6x2xf32>
    %c6_36 = arith.constant 6 : index
    %c0_37 = arith.constant 0 : index
    %c0_38 = arith.constant 0 : index
    %80 = vector.load %arg2[%c6_36, %c0_37, %c0_38] : memref<8x6x2xf32, #tpu.memory_space<vmem>>, vector<1x6x2xf32>
    %81 = vector.shape_cast %80 : vector<1x6x2xf32> to vector<6x2xf32>
    %82 = vector.extract_strided_slice %81 {offsets = [0, 0], sizes = [6, 1], strides = [1, 1]} : vector<6x2xf32> to vector<6x1xf32>
    %83 = vector.shape_cast %82 : vector<6x1xf32> to vector<6x1xf32>
    %84 = vector.broadcast %83 : vector<6x1xf32> to vector<6x2xf32>
    %85 = vector.extract_strided_slice %81 {offsets = [0, 1], sizes = [6, 1], strides = [1, 1]} : vector<6x2xf32> to vector<6x1xf32>
    %86 = vector.shape_cast %85 : vector<6x1xf32> to vector<6x1xf32>
    %87 = vector.broadcast %86 : vector<6x1xf32> to vector<6x2xf32>
    %c7 = arith.constant 7 : index
    %c0_39 = arith.constant 0 : index
    %c0_40 = arith.constant 0 : index
    %88 = vector.load %arg3[%c7, %c0_39, %c0_40] : memref<9x6x1xf32, #tpu.memory_space<vmem>>, vector<1x6x1xf32>
    %89 = vector.shape_cast %88 : vector<1x6x1xf32> to vector<6x1xf32>
    %90 = vector.shape_cast %89 : vector<6x1xf32> to vector<6x1xf32>
    %91 = vector.broadcast %90 : vector<6x1xf32> to vector<6x2xf32>
    %c7_41 = arith.constant 7 : index
    %c0_42 = arith.constant 0 : index
    %c0_43 = arith.constant 0 : index
    %92 = vector.load %arg2[%c7_41, %c0_42, %c0_43] : memref<8x6x2xf32, #tpu.memory_space<vmem>>, vector<1x6x2xf32>
    %93 = vector.shape_cast %92 : vector<1x6x2xf32> to vector<6x2xf32>
    %94 = vector.extract_strided_slice %93 {offsets = [0, 0], sizes = [2, 2], strides = [1, 1]} : vector<6x2xf32> to vector<2x2xf32>
    %95 = vector.extract_strided_slice %94 {offsets = [0, 0], sizes = [2, 1], strides = [1, 1]} : vector<2x2xf32> to vector<2x1xf32>
    %96 = vector.shape_cast %95 : vector<2x1xf32> to vector<2x1xf32>
    %97 = vector.broadcast %96 : vector<2x1xf32> to vector<2x2xf32>
    %98 = vector.extract_strided_slice %94 {offsets = [0, 1], sizes = [2, 1], strides = [1, 1]} : vector<2x2xf32> to vector<2x1xf32>
    %99 = vector.shape_cast %98 : vector<2x1xf32> to vector<2x1xf32>
    %100 = vector.broadcast %99 : vector<2x1xf32> to vector<2x2xf32>
    %c8 = arith.constant 8 : index
    %c0_44 = arith.constant 0 : index
    %c0_45 = arith.constant 0 : index
    %101 = vector.load %arg3[%c8, %c0_44, %c0_45] : memref<9x6x1xf32, #tpu.memory_space<vmem>>, vector<1x6x1xf32>
    %102 = vector.shape_cast %101 : vector<1x6x1xf32> to vector<6x1xf32>
    %103 = vector.extract_strided_slice %102 {offsets = [0, 0], sizes = [2, 1], strides = [1, 1]} : vector<6x1xf32> to vector<2x1xf32>
    %104 = vector.shape_cast %103 : vector<2x1xf32> to vector<2x1xf32>
    %105 = vector.broadcast %104 : vector<2x1xf32> to vector<2x2xf32>
    %cst_46 = arith.constant 0.000000e+00 : f32
    %106 = vector.broadcast %cst_46 : f32 to vector<2x2xf32>
    %cst_47 = arith.constant 0.000000e+00 : f32
    %107 = vector.broadcast %cst_47 : f32 to vector<2x2xf32>
    %108 = vector.extract_strided_slice %7 {offsets = [0, 0], sizes = [6, 2], strides = [1, 1]} : vector<6x16xf32> to vector<6x2xf32>
    %109 = vector.extract_strided_slice %106 {offsets = [0, 0], sizes = [1, 2], strides = [1, 1]} : vector<2x2xf32> to vector<1x2xf32>
    %110 = vector.broadcast %109 : vector<1x2xf32> to vector<6x2xf32>
    %111 = arith.mulf %12, %110 : vector<6x2xf32>
    %112 = vector.extract_strided_slice %106 {offsets = [1, 0], sizes = [1, 2], strides = [1, 1]} : vector<2x2xf32> to vector<1x2xf32>
    %113 = vector.broadcast %112 : vector<1x2xf32> to vector<6x2xf32>
    %114 = arith.mulf %15, %113 : vector<6x2xf32>
    %115 = arith.addf %111, %114 : vector<6x2xf32>
    %116 = arith.addf %115, %19 : vector<6x2xf32>
    %117 = vector.extract_strided_slice %108 {offsets = [0, 0], sizes = [4, 2], strides = [1, 1]} : vector<6x2xf32> to vector<4x2xf32>
    %118 = vector.extract_strided_slice %116 {offsets = [0, 0], sizes = [4, 2], strides = [1, 1]} : vector<6x2xf32> to vector<4x2xf32>
    %119 = arith.addf %117, %118 : vector<4x2xf32>
    %cst_48 = arith.constant 5.000000e-01 : f32
    %120 = vector.broadcast %cst_48 : f32 to vector<4x2xf32>
    %121 = arith.mulf %120, %119 : vector<4x2xf32>
    %122 = math.tanh %121 : vector<4x2xf32>
    %cst_49 = arith.constant 5.000000e-01 : f32
    %123 = vector.broadcast %cst_49 : f32 to vector<4x2xf32>
    %124 = arith.mulf %123, %122 : vector<4x2xf32>
    %cst_50 = arith.constant 5.000000e-01 : f32
    %125 = vector.broadcast %cst_50 : f32 to vector<4x2xf32>
    %126 = arith.addf %124, %125 : vector<4x2xf32>
    %127 = vector.extract_strided_slice %126 {offsets = [0, 0], sizes = [2, 2], strides = [1, 1]} : vector<4x2xf32> to vector<2x2xf32>
    %128 = vector.extract_strided_slice %126 {offsets = [2, 0], sizes = [2, 2], strides = [1, 1]} : vector<4x2xf32> to vector<2x2xf32>
    %129 = vector.extract_strided_slice %108 {offsets = [4, 0], sizes = [2, 2], strides = [1, 1]} : vector<6x2xf32> to vector<2x2xf32>
    %130 = vector.extract_strided_slice %116 {offsets = [4, 0], sizes = [2, 2], strides = [1, 1]} : vector<6x2xf32> to vector<2x2xf32>
    %131 = arith.mulf %127, %130 : vector<2x2xf32>
    %132 = arith.addf %129, %131 : vector<2x2xf32>
    %133 = math.tanh %132 : vector<2x2xf32>
    %134 = arith.subf %106, %133 : vector<2x2xf32>
    %135 = arith.mulf %128, %134 : vector<2x2xf32>
    %136 = arith.addf %133, %135 : vector<2x2xf32>
    %137 = vector.extract_strided_slice %136 {offsets = [0, 0], sizes = [1, 2], strides = [1, 1]} : vector<2x2xf32> to vector<1x2xf32>
    %138 = vector.broadcast %137 : vector<1x2xf32> to vector<6x2xf32>
    %139 = arith.mulf %24, %138 : vector<6x2xf32>
    %140 = vector.extract_strided_slice %136 {offsets = [1, 0], sizes = [1, 2], strides = [1, 1]} : vector<2x2xf32> to vector<1x2xf32>
    %141 = vector.broadcast %140 : vector<1x2xf32> to vector<6x2xf32>
    %142 = arith.mulf %27, %141 : vector<6x2xf32>
    %143 = arith.addf %139, %142 : vector<6x2xf32>
    %144 = arith.addf %143, %31 : vector<6x2xf32>
    %145 = vector.extract_strided_slice %107 {offsets = [0, 0], sizes = [1, 2], strides = [1, 1]} : vector<2x2xf32> to vector<1x2xf32>
    %146 = vector.broadcast %145 : vector<1x2xf32> to vector<6x2xf32>
    %147 = arith.mulf %36, %146 : vector<6x2xf32>
    %148 = vector.extract_strided_slice %107 {offsets = [1, 0], sizes = [1, 2], strides = [1, 1]} : vector<2x2xf32> to vector<1x2xf32>
    %149 = vector.broadcast %148 : vector<1x2xf32> to vector<6x2xf32>
    %150 = arith.mulf %39, %149 : vector<6x2xf32>
    %151 = arith.addf %147, %150 : vector<6x2xf32>
    %152 = arith.addf %151, %43 : vector<6x2xf32>
    %153 = vector.extract_strided_slice %144 {offsets = [0, 0], sizes = [4, 2], strides = [1, 1]} : vector<6x2xf32> to vector<4x2xf32>
    %154 = vector.extract_strided_slice %152 {offsets = [0, 0], sizes = [4, 2], strides = [1, 1]} : vector<6x2xf32> to vector<4x2xf32>
    %155 = arith.addf %153, %154 : vector<4x2xf32>
    %cst_51 = arith.constant 5.000000e-01 : f32
    %156 = vector.broadcast %cst_51 : f32 to vector<4x2xf32>
    %157 = arith.mulf %156, %155 : vector<4x2xf32>
    %158 = math.tanh %157 : vector<4x2xf32>
    %cst_52 = arith.constant 5.000000e-01 : f32
    %159 = vector.broadcast %cst_52 : f32 to vector<4x2xf32>
    %160 = arith.mulf %159, %158 : vector<4x2xf32>
    %cst_53 = arith.constant 5.000000e-01 : f32
    %161 = vector.broadcast %cst_53 : f32 to vector<4x2xf32>
    %162 = arith.addf %160, %161 : vector<4x2xf32>
    %163 = vector.extract_strided_slice %162 {offsets = [0, 0], sizes = [2, 2], strides = [1, 1]} : vector<4x2xf32> to vector<2x2xf32>
    %164 = vector.extract_strided_slice %162 {offsets = [2, 0], sizes = [2, 2], strides = [1, 1]} : vector<4x2xf32> to vector<2x2xf32>
    %165 = vector.extract_strided_slice %144 {offsets = [4, 0], sizes = [2, 2], strides = [1, 1]} : vector<6x2xf32> to vector<2x2xf32>
    %166 = vector.extract_strided_slice %152 {offsets = [4, 0], sizes = [2, 2], strides = [1, 1]} : vector<6x2xf32> to vector<2x2xf32>
    %167 = arith.mulf %163, %166 : vector<2x2xf32>
    %168 = arith.addf %165, %167 : vector<2x2xf32>
    %169 = math.tanh %168 : vector<2x2xf32>
    %170 = arith.subf %107, %169 : vector<2x2xf32>
    %171 = arith.mulf %164, %170 : vector<2x2xf32>
    %172 = arith.addf %169, %171 : vector<2x2xf32>
    %173 = vector.extract_strided_slice %7 {offsets = [0, 2], sizes = [6, 2], strides = [1, 1]} : vector<6x16xf32> to vector<6x2xf32>
    %174 = vector.extract_strided_slice %136 {offsets = [0, 0], sizes = [1, 2], strides = [1, 1]} : vector<2x2xf32> to vector<1x2xf32>
    %175 = vector.broadcast %174 : vector<1x2xf32> to vector<6x2xf32>
    %176 = arith.mulf %12, %175 : vector<6x2xf32>
    %177 = vector.extract_strided_slice %136 {offsets = [1, 0], sizes = [1, 2], strides = [1, 1]} : vector<2x2xf32> to vector<1x2xf32>
    %178 = vector.broadcast %177 : vector<1x2xf32> to vector<6x2xf32>
    %179 = arith.mulf %15, %178 : vector<6x2xf32>
    %180 = arith.addf %176, %179 : vector<6x2xf32>
    %181 = arith.addf %180, %19 : vector<6x2xf32>
    %182 = vector.extract_strided_slice %173 {offsets = [0, 0], sizes = [4, 2], strides = [1, 1]} : vector<6x2xf32> to vector<4x2xf32>
    %183 = vector.extract_strided_slice %181 {offsets = [0, 0], sizes = [4, 2], strides = [1, 1]} : vector<6x2xf32> to vector<4x2xf32>
    %184 = arith.addf %182, %183 : vector<4x2xf32>
    %cst_54 = arith.constant 5.000000e-01 : f32
    %185 = vector.broadcast %cst_54 : f32 to vector<4x2xf32>
    %186 = arith.mulf %185, %184 : vector<4x2xf32>
    %187 = math.tanh %186 : vector<4x2xf32>
    %cst_55 = arith.constant 5.000000e-01 : f32
    %188 = vector.broadcast %cst_55 : f32 to vector<4x2xf32>
    %189 = arith.mulf %188, %187 : vector<4x2xf32>
    %cst_56 = arith.constant 5.000000e-01 : f32
    %190 = vector.broadcast %cst_56 : f32 to vector<4x2xf32>
    %191 = arith.addf %189, %190 : vector<4x2xf32>
    %192 = vector.extract_strided_slice %191 {offsets = [0, 0], sizes = [2, 2], strides = [1, 1]} : vector<4x2xf32> to vector<2x2xf32>
    %193 = vector.extract_strided_slice %191 {offsets = [2, 0], sizes = [2, 2], strides = [1, 1]} : vector<4x2xf32> to vector<2x2xf32>
    %194 = vector.extract_strided_slice %173 {offsets = [4, 0], sizes = [2, 2], strides = [1, 1]} : vector<6x2xf32> to vector<2x2xf32>
    %195 = vector.extract_strided_slice %181 {offsets = [4, 0], sizes = [2, 2], strides = [1, 1]} : vector<6x2xf32> to vector<2x2xf32>
    %196 = arith.mulf %192, %195 : vector<2x2xf32>
    %197 = arith.addf %194, %196 : vector<2x2xf32>
    %198 = math.tanh %197 : vector<2x2xf32>
    %199 = arith.subf %136, %198 : vector<2x2xf32>
    %200 = arith.mulf %193, %199 : vector<2x2xf32>
    %201 = arith.addf %198, %200 : vector<2x2xf32>
    %202 = vector.extract_strided_slice %201 {offsets = [0, 0], sizes = [1, 2], strides = [1, 1]} : vector<2x2xf32> to vector<1x2xf32>
    %203 = vector.broadcast %202 : vector<1x2xf32> to vector<6x2xf32>
    %204 = arith.mulf %24, %203 : vector<6x2xf32>
    %205 = vector.extract_strided_slice %201 {offsets = [1, 0], sizes = [1, 2], strides = [1, 1]} : vector<2x2xf32> to vector<1x2xf32>
    %206 = vector.broadcast %205 : vector<1x2xf32> to vector<6x2xf32>
    %207 = arith.mulf %27, %206 : vector<6x2xf32>
    %208 = arith.addf %204, %207 : vector<6x2xf32>
    %209 = arith.addf %208, %31 : vector<6x2xf32>
    %210 = vector.extract_strided_slice %172 {offsets = [0, 0], sizes = [1, 2], strides = [1, 1]} : vector<2x2xf32> to vector<1x2xf32>
    %211 = vector.broadcast %210 : vector<1x2xf32> to vector<6x2xf32>
    %212 = arith.mulf %36, %211 : vector<6x2xf32>
    %213 = vector.extract_strided_slice %172 {offsets = [1, 0], sizes = [1, 2], strides = [1, 1]} : vector<2x2xf32> to vector<1x2xf32>
    %214 = vector.broadcast %213 : vector<1x2xf32> to vector<6x2xf32>
    %215 = arith.mulf %39, %214 : vector<6x2xf32>
    %216 = arith.addf %212, %215 : vector<6x2xf32>
    %217 = arith.addf %216, %43 : vector<6x2xf32>
    %218 = vector.extract_strided_slice %209 {offsets = [0, 0], sizes = [4, 2], strides = [1, 1]} : vector<6x2xf32> to vector<4x2xf32>
    %219 = vector.extract_strided_slice %217 {offsets = [0, 0], sizes = [4, 2], strides = [1, 1]} : vector<6x2xf32> to vector<4x2xf32>
    %220 = arith.addf %218, %219 : vector<4x2xf32>
    %cst_57 = arith.constant 5.000000e-01 : f32
    %221 = vector.broadcast %cst_57 : f32 to vector<4x2xf32>
    %222 = arith.mulf %221, %220 : vector<4x2xf32>
    %223 = math.tanh %222 : vector<4x2xf32>
    %cst_58 = arith.constant 5.000000e-01 : f32
    %224 = vector.broadcast %cst_58 : f32 to vector<4x2xf32>
    %225 = arith.mulf %224, %223 : vector<4x2xf32>
    %cst_59 = arith.constant 5.000000e-01 : f32
    %226 = vector.broadcast %cst_59 : f32 to vector<4x2xf32>
    %227 = arith.addf %225, %226 : vector<4x2xf32>
    %228 = vector.extract_strided_slice %227 {offsets = [0, 0], sizes = [2, 2], strides = [1, 1]} : vector<4x2xf32> to vector<2x2xf32>
    %229 = vector.extract_strided_slice %227 {offsets = [2, 0], sizes = [2, 2], strides = [1, 1]} : vector<4x2xf32> to vector<2x2xf32>
    %230 = vector.extract_strided_slice %209 {offsets = [4, 0], sizes = [2, 2], strides = [1, 1]} : vector<6x2xf32> to vector<2x2xf32>
    %231 = vector.extract_strided_slice %217 {offsets = [4, 0], sizes = [2, 2], strides = [1, 1]} : vector<6x2xf32> to vector<2x2xf32>
    %232 = arith.mulf %228, %231 : vector<2x2xf32>
    %233 = arith.addf %230, %232 : vector<2x2xf32>
    %234 = math.tanh %233 : vector<2x2xf32>
    %235 = arith.subf %172, %234 : vector<2x2xf32>
    %236 = arith.mulf %229, %235 : vector<2x2xf32>
    %237 = arith.addf %234, %236 : vector<2x2xf32>
    %238 = vector.extract_strided_slice %7 {offsets = [0, 4], sizes = [6, 2], strides = [1, 1]} : vector<6x16xf32> to vector<6x2xf32>
    %239 = vector.extract_strided_slice %201 {offsets = [0, 0], sizes = [1, 2], strides = [1, 1]} : vector<2x2xf32> to vector<1x2xf32>
    %240 = vector.broadcast %239 : vector<1x2xf32> to vector<6x2xf32>
    %241 = arith.mulf %12, %240 : vector<6x2xf32>
    %242 = vector.extract_strided_slice %201 {offsets = [1, 0], sizes = [1, 2], strides = [1, 1]} : vector<2x2xf32> to vector<1x2xf32>
    %243 = vector.broadcast %242 : vector<1x2xf32> to vector<6x2xf32>
    %244 = arith.mulf %15, %243 : vector<6x2xf32>
    %245 = arith.addf %241, %244 : vector<6x2xf32>
    %246 = arith.addf %245, %19 : vector<6x2xf32>
    %247 = vector.extract_strided_slice %238 {offsets = [0, 0], sizes = [4, 2], strides = [1, 1]} : vector<6x2xf32> to vector<4x2xf32>
    %248 = vector.extract_strided_slice %246 {offsets = [0, 0], sizes = [4, 2], strides = [1, 1]} : vector<6x2xf32> to vector<4x2xf32>
    %249 = arith.addf %247, %248 : vector<4x2xf32>
    %cst_60 = arith.constant 5.000000e-01 : f32
    %250 = vector.broadcast %cst_60 : f32 to vector<4x2xf32>
    %251 = arith.mulf %250, %249 : vector<4x2xf32>
    %252 = math.tanh %251 : vector<4x2xf32>
    %cst_61 = arith.constant 5.000000e-01 : f32
    %253 = vector.broadcast %cst_61 : f32 to vector<4x2xf32>
    %254 = arith.mulf %253, %252 : vector<4x2xf32>
    %cst_62 = arith.constant 5.000000e-01 : f32
    %255 = vector.broadcast %cst_62 : f32 to vector<4x2xf32>
    %256 = arith.addf %254, %255 : vector<4x2xf32>
    %257 = vector.extract_strided_slice %256 {offsets = [0, 0], sizes = [2, 2], strides = [1, 1]} : vector<4x2xf32> to vector<2x2xf32>
    %258 = vector.extract_strided_slice %256 {offsets = [2, 0], sizes = [2, 2], strides = [1, 1]} : vector<4x2xf32> to vector<2x2xf32>
    %259 = vector.extract_strided_slice %238 {offsets = [4, 0], sizes = [2, 2], strides = [1, 1]} : vector<6x2xf32> to vector<2x2xf32>
    %260 = vector.extract_strided_slice %246 {offsets = [4, 0], sizes = [2, 2], strides = [1, 1]} : vector<6x2xf32> to vector<2x2xf32>
    %261 = arith.mulf %257, %260 : vector<2x2xf32>
    %262 = arith.addf %259, %261 : vector<2x2xf32>
    %263 = math.tanh %262 : vector<2x2xf32>
    %264 = arith.subf %201, %263 : vector<2x2xf32>
    %265 = arith.mulf %258, %264 : vector<2x2xf32>
    %266 = arith.addf %263, %265 : vector<2x2xf32>
    %267 = vector.extract_strided_slice %266 {offsets = [0, 0], sizes = [1, 2], strides = [1, 1]} : vector<2x2xf32> to vector<1x2xf32>
    %268 = vector.broadcast %267 : vector<1x2xf32> to vector<6x2xf32>
    %269 = arith.mulf %24, %268 : vector<6x2xf32>
    %270 = vector.extract_strided_slice %266 {offsets = [1, 0], sizes = [1, 2], strides = [1, 1]} : vector<2x2xf32> to vector<1x2xf32>
    %271 = vector.broadcast %270 : vector<1x2xf32> to vector<6x2xf32>
    %272 = arith.mulf %27, %271 : vector<6x2xf32>
    %273 = arith.addf %269, %272 : vector<6x2xf32>
    %274 = arith.addf %273, %31 : vector<6x2xf32>
    %275 = vector.extract_strided_slice %237 {offsets = [0, 0], sizes = [1, 2], strides = [1, 1]} : vector<2x2xf32> to vector<1x2xf32>
    %276 = vector.broadcast %275 : vector<1x2xf32> to vector<6x2xf32>
    %277 = arith.mulf %36, %276 : vector<6x2xf32>
    %278 = vector.extract_strided_slice %237 {offsets = [1, 0], sizes = [1, 2], strides = [1, 1]} : vector<2x2xf32> to vector<1x2xf32>
    %279 = vector.broadcast %278 : vector<1x2xf32> to vector<6x2xf32>
    %280 = arith.mulf %39, %279 : vector<6x2xf32>
    %281 = arith.addf %277, %280 : vector<6x2xf32>
    %282 = arith.addf %281, %43 : vector<6x2xf32>
    %283 = vector.extract_strided_slice %274 {offsets = [0, 0], sizes = [4, 2], strides = [1, 1]} : vector<6x2xf32> to vector<4x2xf32>
    %284 = vector.extract_strided_slice %282 {offsets = [0, 0], sizes = [4, 2], strides = [1, 1]} : vector<6x2xf32> to vector<4x2xf32>
    %285 = arith.addf %283, %284 : vector<4x2xf32>
    %cst_63 = arith.constant 5.000000e-01 : f32
    %286 = vector.broadcast %cst_63 : f32 to vector<4x2xf32>
    %287 = arith.mulf %286, %285 : vector<4x2xf32>
    %288 = math.tanh %287 : vector<4x2xf32>
    %cst_64 = arith.constant 5.000000e-01 : f32
    %289 = vector.broadcast %cst_64 : f32 to vector<4x2xf32>
    %290 = arith.mulf %289, %288 : vector<4x2xf32>
    %cst_65 = arith.constant 5.000000e-01 : f32
    %291 = vector.broadcast %cst_65 : f32 to vector<4x2xf32>
    %292 = arith.addf %290, %291 : vector<4x2xf32>
    %293 = vector.extract_strided_slice %292 {offsets = [0, 0], sizes = [2, 2], strides = [1, 1]} : vector<4x2xf32> to vector<2x2xf32>
    %294 = vector.extract_strided_slice %292 {offsets = [2, 0], sizes = [2, 2], strides = [1, 1]} : vector<4x2xf32> to vector<2x2xf32>
    %295 = vector.extract_strided_slice %274 {offsets = [4, 0], sizes = [2, 2], strides = [1, 1]} : vector<6x2xf32> to vector<2x2xf32>
    %296 = vector.extract_strided_slice %282 {offsets = [4, 0], sizes = [2, 2], strides = [1, 1]} : vector<6x2xf32> to vector<2x2xf32>
    %297 = arith.mulf %293, %296 : vector<2x2xf32>
    %298 = arith.addf %295, %297 : vector<2x2xf32>
    %299 = math.tanh %298 : vector<2x2xf32>
    %300 = arith.subf %237, %299 : vector<2x2xf32>
    %301 = arith.mulf %294, %300 : vector<2x2xf32>
    %302 = arith.addf %299, %301 : vector<2x2xf32>
    %303 = vector.extract_strided_slice %7 {offsets = [0, 6], sizes = [6, 2], strides = [1, 1]} : vector<6x16xf32> to vector<6x2xf32>
    %304 = vector.extract_strided_slice %266 {offsets = [0, 0], sizes = [1, 2], strides = [1, 1]} : vector<2x2xf32> to vector<1x2xf32>
    %305 = vector.broadcast %304 : vector<1x2xf32> to vector<6x2xf32>
    %306 = arith.mulf %12, %305 : vector<6x2xf32>
    %307 = vector.extract_strided_slice %266 {offsets = [1, 0], sizes = [1, 2], strides = [1, 1]} : vector<2x2xf32> to vector<1x2xf32>
    %308 = vector.broadcast %307 : vector<1x2xf32> to vector<6x2xf32>
    %309 = arith.mulf %15, %308 : vector<6x2xf32>
    %310 = arith.addf %306, %309 : vector<6x2xf32>
    %311 = arith.addf %310, %19 : vector<6x2xf32>
    %312 = vector.extract_strided_slice %303 {offsets = [0, 0], sizes = [4, 2], strides = [1, 1]} : vector<6x2xf32> to vector<4x2xf32>
    %313 = vector.extract_strided_slice %311 {offsets = [0, 0], sizes = [4, 2], strides = [1, 1]} : vector<6x2xf32> to vector<4x2xf32>
    %314 = arith.addf %312, %313 : vector<4x2xf32>
    %cst_66 = arith.constant 5.000000e-01 : f32
    %315 = vector.broadcast %cst_66 : f32 to vector<4x2xf32>
    %316 = arith.mulf %315, %314 : vector<4x2xf32>
    %317 = math.tanh %316 : vector<4x2xf32>
    %cst_67 = arith.constant 5.000000e-01 : f32
    %318 = vector.broadcast %cst_67 : f32 to vector<4x2xf32>
    %319 = arith.mulf %318, %317 : vector<4x2xf32>
    %cst_68 = arith.constant 5.000000e-01 : f32
    %320 = vector.broadcast %cst_68 : f32 to vector<4x2xf32>
    %321 = arith.addf %319, %320 : vector<4x2xf32>
    %322 = vector.extract_strided_slice %321 {offsets = [0, 0], sizes = [2, 2], strides = [1, 1]} : vector<4x2xf32> to vector<2x2xf32>
    %323 = vector.extract_strided_slice %321 {offsets = [2, 0], sizes = [2, 2], strides = [1, 1]} : vector<4x2xf32> to vector<2x2xf32>
    %324 = vector.extract_strided_slice %303 {offsets = [4, 0], sizes = [2, 2], strides = [1, 1]} : vector<6x2xf32> to vector<2x2xf32>
    %325 = vector.extract_strided_slice %311 {offsets = [4, 0], sizes = [2, 2], strides = [1, 1]} : vector<6x2xf32> to vector<2x2xf32>
    %326 = arith.mulf %322, %325 : vector<2x2xf32>
    %327 = arith.addf %324, %326 : vector<2x2xf32>
    %328 = math.tanh %327 : vector<2x2xf32>
    %329 = arith.subf %266, %328 : vector<2x2xf32>
    %330 = arith.mulf %323, %329 : vector<2x2xf32>
    %331 = arith.addf %328, %330 : vector<2x2xf32>
    %332 = vector.extract_strided_slice %331 {offsets = [0, 0], sizes = [1, 2], strides = [1, 1]} : vector<2x2xf32> to vector<1x2xf32>
    %333 = vector.broadcast %332 : vector<1x2xf32> to vector<6x2xf32>
    %334 = arith.mulf %24, %333 : vector<6x2xf32>
    %335 = vector.extract_strided_slice %331 {offsets = [1, 0], sizes = [1, 2], strides = [1, 1]} : vector<2x2xf32> to vector<1x2xf32>
    %336 = vector.broadcast %335 : vector<1x2xf32> to vector<6x2xf32>
    %337 = arith.mulf %27, %336 : vector<6x2xf32>
    %338 = arith.addf %334, %337 : vector<6x2xf32>
    %339 = arith.addf %338, %31 : vector<6x2xf32>
    %340 = vector.extract_strided_slice %302 {offsets = [0, 0], sizes = [1, 2], strides = [1, 1]} : vector<2x2xf32> to vector<1x2xf32>
    %341 = vector.broadcast %340 : vector<1x2xf32> to vector<6x2xf32>
    %342 = arith.mulf %36, %341 : vector<6x2xf32>
    %343 = vector.extract_strided_slice %302 {offsets = [1, 0], sizes = [1, 2], strides = [1, 1]} : vector<2x2xf32> to vector<1x2xf32>
    %344 = vector.broadcast %343 : vector<1x2xf32> to vector<6x2xf32>
    %345 = arith.mulf %39, %344 : vector<6x2xf32>
    %346 = arith.addf %342, %345 : vector<6x2xf32>
    %347 = arith.addf %346, %43 : vector<6x2xf32>
    %348 = vector.extract_strided_slice %339 {offsets = [0, 0], sizes = [4, 2], strides = [1, 1]} : vector<6x2xf32> to vector<4x2xf32>
    %349 = vector.extract_strided_slice %347 {offsets = [0, 0], sizes = [4, 2], strides = [1, 1]} : vector<6x2xf32> to vector<4x2xf32>
    %350 = arith.addf %348, %349 : vector<4x2xf32>
    %cst_69 = arith.constant 5.000000e-01 : f32
    %351 = vector.broadcast %cst_69 : f32 to vector<4x2xf32>
    %352 = arith.mulf %351, %350 : vector<4x2xf32>
    %353 = math.tanh %352 : vector<4x2xf32>
    %cst_70 = arith.constant 5.000000e-01 : f32
    %354 = vector.broadcast %cst_70 : f32 to vector<4x2xf32>
    %355 = arith.mulf %354, %353 : vector<4x2xf32>
    %cst_71 = arith.constant 5.000000e-01 : f32
    %356 = vector.broadcast %cst_71 : f32 to vector<4x2xf32>
    %357 = arith.addf %355, %356 : vector<4x2xf32>
    %358 = vector.extract_strided_slice %357 {offsets = [0, 0], sizes = [2, 2], strides = [1, 1]} : vector<4x2xf32> to vector<2x2xf32>
    %359 = vector.extract_strided_slice %357 {offsets = [2, 0], sizes = [2, 2], strides = [1, 1]} : vector<4x2xf32> to vector<2x2xf32>
    %360 = vector.extract_strided_slice %339 {offsets = [4, 0], sizes = [2, 2], strides = [1, 1]} : vector<6x2xf32> to vector<2x2xf32>
    %361 = vector.extract_strided_slice %347 {offsets = [4, 0], sizes = [2, 2], strides = [1, 1]} : vector<6x2xf32> to vector<2x2xf32>
    %362 = arith.mulf %358, %361 : vector<2x2xf32>
    %363 = arith.addf %360, %362 : vector<2x2xf32>
    %364 = math.tanh %363 : vector<2x2xf32>
    %365 = arith.subf %302, %364 : vector<2x2xf32>
    %366 = arith.mulf %359, %365 : vector<2x2xf32>
    %367 = arith.addf %364, %366 : vector<2x2xf32>
    %368 = vector.extract_strided_slice %7 {offsets = [0, 8], sizes = [6, 2], strides = [1, 1]} : vector<6x16xf32> to vector<6x2xf32>
    %369 = vector.extract_strided_slice %331 {offsets = [0, 0], sizes = [1, 2], strides = [1, 1]} : vector<2x2xf32> to vector<1x2xf32>
    %370 = vector.broadcast %369 : vector<1x2xf32> to vector<6x2xf32>
    %371 = arith.mulf %12, %370 : vector<6x2xf32>
    %372 = vector.extract_strided_slice %331 {offsets = [1, 0], sizes = [1, 2], strides = [1, 1]} : vector<2x2xf32> to vector<1x2xf32>
    %373 = vector.broadcast %372 : vector<1x2xf32> to vector<6x2xf32>
    %374 = arith.mulf %15, %373 : vector<6x2xf32>
    %375 = arith.addf %371, %374 : vector<6x2xf32>
    %376 = arith.addf %375, %19 : vector<6x2xf32>
    %377 = vector.extract_strided_slice %368 {offsets = [0, 0], sizes = [4, 2], strides = [1, 1]} : vector<6x2xf32> to vector<4x2xf32>
    %378 = vector.extract_strided_slice %376 {offsets = [0, 0], sizes = [4, 2], strides = [1, 1]} : vector<6x2xf32> to vector<4x2xf32>
    %379 = arith.addf %377, %378 : vector<4x2xf32>
    %cst_72 = arith.constant 5.000000e-01 : f32
    %380 = vector.broadcast %cst_72 : f32 to vector<4x2xf32>
    %381 = arith.mulf %380, %379 : vector<4x2xf32>
    %382 = math.tanh %381 : vector<4x2xf32>
    %cst_73 = arith.constant 5.000000e-01 : f32
    %383 = vector.broadcast %cst_73 : f32 to vector<4x2xf32>
    %384 = arith.mulf %383, %382 : vector<4x2xf32>
    %cst_74 = arith.constant 5.000000e-01 : f32
    %385 = vector.broadcast %cst_74 : f32 to vector<4x2xf32>
    %386 = arith.addf %384, %385 : vector<4x2xf32>
    %387 = vector.extract_strided_slice %386 {offsets = [0, 0], sizes = [2, 2], strides = [1, 1]} : vector<4x2xf32> to vector<2x2xf32>
    %388 = vector.extract_strided_slice %386 {offsets = [2, 0], sizes = [2, 2], strides = [1, 1]} : vector<4x2xf32> to vector<2x2xf32>
    %389 = vector.extract_strided_slice %368 {offsets = [4, 0], sizes = [2, 2], strides = [1, 1]} : vector<6x2xf32> to vector<2x2xf32>
    %390 = vector.extract_strided_slice %376 {offsets = [4, 0], sizes = [2, 2], strides = [1, 1]} : vector<6x2xf32> to vector<2x2xf32>
    %391 = arith.mulf %387, %390 : vector<2x2xf32>
    %392 = arith.addf %389, %391 : vector<2x2xf32>
    %393 = math.tanh %392 : vector<2x2xf32>
    %394 = arith.subf %331, %393 : vector<2x2xf32>
    %395 = arith.mulf %388, %394 : vector<2x2xf32>
    %396 = arith.addf %393, %395 : vector<2x2xf32>
    %397 = vector.extract_strided_slice %396 {offsets = [0, 0], sizes = [1, 2], strides = [1, 1]} : vector<2x2xf32> to vector<1x2xf32>
    %398 = vector.broadcast %397 : vector<1x2xf32> to vector<6x2xf32>
    %399 = arith.mulf %24, %398 : vector<6x2xf32>
    %400 = vector.extract_strided_slice %396 {offsets = [1, 0], sizes = [1, 2], strides = [1, 1]} : vector<2x2xf32> to vector<1x2xf32>
    %401 = vector.broadcast %400 : vector<1x2xf32> to vector<6x2xf32>
    %402 = arith.mulf %27, %401 : vector<6x2xf32>
    %403 = arith.addf %399, %402 : vector<6x2xf32>
    %404 = arith.addf %403, %31 : vector<6x2xf32>
    %405 = vector.extract_strided_slice %367 {offsets = [0, 0], sizes = [1, 2], strides = [1, 1]} : vector<2x2xf32> to vector<1x2xf32>
    %406 = vector.broadcast %405 : vector<1x2xf32> to vector<6x2xf32>
    %407 = arith.mulf %36, %406 : vector<6x2xf32>
    %408 = vector.extract_strided_slice %367 {offsets = [1, 0], sizes = [1, 2], strides = [1, 1]} : vector<2x2xf32> to vector<1x2xf32>
    %409 = vector.broadcast %408 : vector<1x2xf32> to vector<6x2xf32>
    %410 = arith.mulf %39, %409 : vector<6x2xf32>
    %411 = arith.addf %407, %410 : vector<6x2xf32>
    %412 = arith.addf %411, %43 : vector<6x2xf32>
    %413 = vector.extract_strided_slice %404 {offsets = [0, 0], sizes = [4, 2], strides = [1, 1]} : vector<6x2xf32> to vector<4x2xf32>
    %414 = vector.extract_strided_slice %412 {offsets = [0, 0], sizes = [4, 2], strides = [1, 1]} : vector<6x2xf32> to vector<4x2xf32>
    %415 = arith.addf %413, %414 : vector<4x2xf32>
    %cst_75 = arith.constant 5.000000e-01 : f32
    %416 = vector.broadcast %cst_75 : f32 to vector<4x2xf32>
    %417 = arith.mulf %416, %415 : vector<4x2xf32>
    %418 = math.tanh %417 : vector<4x2xf32>
    %cst_76 = arith.constant 5.000000e-01 : f32
    %419 = vector.broadcast %cst_76 : f32 to vector<4x2xf32>
    %420 = arith.mulf %419, %418 : vector<4x2xf32>
    %cst_77 = arith.constant 5.000000e-01 : f32
    %421 = vector.broadcast %cst_77 : f32 to vector<4x2xf32>
    %422 = arith.addf %420, %421 : vector<4x2xf32>
    %423 = vector.extract_strided_slice %422 {offsets = [0, 0], sizes = [2, 2], strides = [1, 1]} : vector<4x2xf32> to vector<2x2xf32>
    %424 = vector.extract_strided_slice %422 {offsets = [2, 0], sizes = [2, 2], strides = [1, 1]} : vector<4x2xf32> to vector<2x2xf32>
    %425 = vector.extract_strided_slice %404 {offsets = [4, 0], sizes = [2, 2], strides = [1, 1]} : vector<6x2xf32> to vector<2x2xf32>
    %426 = vector.extract_strided_slice %412 {offsets = [4, 0], sizes = [2, 2], strides = [1, 1]} : vector<6x2xf32> to vector<2x2xf32>
    %427 = arith.mulf %423, %426 : vector<2x2xf32>
    %428 = arith.addf %425, %427 : vector<2x2xf32>
    %429 = math.tanh %428 : vector<2x2xf32>
    %430 = arith.subf %367, %429 : vector<2x2xf32>
    %431 = arith.mulf %424, %430 : vector<2x2xf32>
    %432 = arith.addf %429, %431 : vector<2x2xf32>
    %433 = vector.extract_strided_slice %7 {offsets = [0, 10], sizes = [6, 2], strides = [1, 1]} : vector<6x16xf32> to vector<6x2xf32>
    %434 = vector.extract_strided_slice %396 {offsets = [0, 0], sizes = [1, 2], strides = [1, 1]} : vector<2x2xf32> to vector<1x2xf32>
    %435 = vector.broadcast %434 : vector<1x2xf32> to vector<6x2xf32>
    %436 = arith.mulf %12, %435 : vector<6x2xf32>
    %437 = vector.extract_strided_slice %396 {offsets = [1, 0], sizes = [1, 2], strides = [1, 1]} : vector<2x2xf32> to vector<1x2xf32>
    %438 = vector.broadcast %437 : vector<1x2xf32> to vector<6x2xf32>
    %439 = arith.mulf %15, %438 : vector<6x2xf32>
    %440 = arith.addf %436, %439 : vector<6x2xf32>
    %441 = arith.addf %440, %19 : vector<6x2xf32>
    %442 = vector.extract_strided_slice %433 {offsets = [0, 0], sizes = [4, 2], strides = [1, 1]} : vector<6x2xf32> to vector<4x2xf32>
    %443 = vector.extract_strided_slice %441 {offsets = [0, 0], sizes = [4, 2], strides = [1, 1]} : vector<6x2xf32> to vector<4x2xf32>
    %444 = arith.addf %442, %443 : vector<4x2xf32>
    %cst_78 = arith.constant 5.000000e-01 : f32
    %445 = vector.broadcast %cst_78 : f32 to vector<4x2xf32>
    %446 = arith.mulf %445, %444 : vector<4x2xf32>
    %447 = math.tanh %446 : vector<4x2xf32>
    %cst_79 = arith.constant 5.000000e-01 : f32
    %448 = vector.broadcast %cst_79 : f32 to vector<4x2xf32>
    %449 = arith.mulf %448, %447 : vector<4x2xf32>
    %cst_80 = arith.constant 5.000000e-01 : f32
    %450 = vector.broadcast %cst_80 : f32 to vector<4x2xf32>
    %451 = arith.addf %449, %450 : vector<4x2xf32>
    %452 = vector.extract_strided_slice %451 {offsets = [0, 0], sizes = [2, 2], strides = [1, 1]} : vector<4x2xf32> to vector<2x2xf32>
    %453 = vector.extract_strided_slice %451 {offsets = [2, 0], sizes = [2, 2], strides = [1, 1]} : vector<4x2xf32> to vector<2x2xf32>
    %454 = vector.extract_strided_slice %433 {offsets = [4, 0], sizes = [2, 2], strides = [1, 1]} : vector<6x2xf32> to vector<2x2xf32>
    %455 = vector.extract_strided_slice %441 {offsets = [4, 0], sizes = [2, 2], strides = [1, 1]} : vector<6x2xf32> to vector<2x2xf32>
    %456 = arith.mulf %452, %455 : vector<2x2xf32>
    %457 = arith.addf %454, %456 : vector<2x2xf32>
    %458 = math.tanh %457 : vector<2x2xf32>
    %459 = arith.subf %396, %458 : vector<2x2xf32>
    %460 = arith.mulf %453, %459 : vector<2x2xf32>
    %461 = arith.addf %458, %460 : vector<2x2xf32>
    %462 = vector.extract_strided_slice %461 {offsets = [0, 0], sizes = [1, 2], strides = [1, 1]} : vector<2x2xf32> to vector<1x2xf32>
    %463 = vector.broadcast %462 : vector<1x2xf32> to vector<6x2xf32>
    %464 = arith.mulf %24, %463 : vector<6x2xf32>
    %465 = vector.extract_strided_slice %461 {offsets = [1, 0], sizes = [1, 2], strides = [1, 1]} : vector<2x2xf32> to vector<1x2xf32>
    %466 = vector.broadcast %465 : vector<1x2xf32> to vector<6x2xf32>
    %467 = arith.mulf %27, %466 : vector<6x2xf32>
    %468 = arith.addf %464, %467 : vector<6x2xf32>
    %469 = arith.addf %468, %31 : vector<6x2xf32>
    %470 = vector.extract_strided_slice %432 {offsets = [0, 0], sizes = [1, 2], strides = [1, 1]} : vector<2x2xf32> to vector<1x2xf32>
    %471 = vector.broadcast %470 : vector<1x2xf32> to vector<6x2xf32>
    %472 = arith.mulf %36, %471 : vector<6x2xf32>
    %473 = vector.extract_strided_slice %432 {offsets = [1, 0], sizes = [1, 2], strides = [1, 1]} : vector<2x2xf32> to vector<1x2xf32>
    %474 = vector.broadcast %473 : vector<1x2xf32> to vector<6x2xf32>
    %475 = arith.mulf %39, %474 : vector<6x2xf32>
    %476 = arith.addf %472, %475 : vector<6x2xf32>
    %477 = arith.addf %476, %43 : vector<6x2xf32>
    %478 = vector.extract_strided_slice %469 {offsets = [0, 0], sizes = [4, 2], strides = [1, 1]} : vector<6x2xf32> to vector<4x2xf32>
    %479 = vector.extract_strided_slice %477 {offsets = [0, 0], sizes = [4, 2], strides = [1, 1]} : vector<6x2xf32> to vector<4x2xf32>
    %480 = arith.addf %478, %479 : vector<4x2xf32>
    %cst_81 = arith.constant 5.000000e-01 : f32
    %481 = vector.broadcast %cst_81 : f32 to vector<4x2xf32>
    %482 = arith.mulf %481, %480 : vector<4x2xf32>
    %483 = math.tanh %482 : vector<4x2xf32>
    %cst_82 = arith.constant 5.000000e-01 : f32
    %484 = vector.broadcast %cst_82 : f32 to vector<4x2xf32>
    %485 = arith.mulf %484, %483 : vector<4x2xf32>
    %cst_83 = arith.constant 5.000000e-01 : f32
    %486 = vector.broadcast %cst_83 : f32 to vector<4x2xf32>
    %487 = arith.addf %485, %486 : vector<4x2xf32>
    %488 = vector.extract_strided_slice %487 {offsets = [0, 0], sizes = [2, 2], strides = [1, 1]} : vector<4x2xf32> to vector<2x2xf32>
    %489 = vector.extract_strided_slice %487 {offsets = [2, 0], sizes = [2, 2], strides = [1, 1]} : vector<4x2xf32> to vector<2x2xf32>
    %490 = vector.extract_strided_slice %469 {offsets = [4, 0], sizes = [2, 2], strides = [1, 1]} : vector<6x2xf32> to vector<2x2xf32>
    %491 = vector.extract_strided_slice %477 {offsets = [4, 0], sizes = [2, 2], strides = [1, 1]} : vector<6x2xf32> to vector<2x2xf32>
    %492 = arith.mulf %488, %491 : vector<2x2xf32>
    %493 = arith.addf %490, %492 : vector<2x2xf32>
    %494 = math.tanh %493 : vector<2x2xf32>
    %495 = arith.subf %432, %494 : vector<2x2xf32>
    %496 = arith.mulf %489, %495 : vector<2x2xf32>
    %497 = arith.addf %494, %496 : vector<2x2xf32>
    %498 = vector.extract_strided_slice %7 {offsets = [0, 12], sizes = [6, 2], strides = [1, 1]} : vector<6x16xf32> to vector<6x2xf32>
    %499 = vector.extract_strided_slice %461 {offsets = [0, 0], sizes = [1, 2], strides = [1, 1]} : vector<2x2xf32> to vector<1x2xf32>
    %500 = vector.broadcast %499 : vector<1x2xf32> to vector<6x2xf32>
    %501 = arith.mulf %12, %500 : vector<6x2xf32>
    %502 = vector.extract_strided_slice %461 {offsets = [1, 0], sizes = [1, 2], strides = [1, 1]} : vector<2x2xf32> to vector<1x2xf32>
    %503 = vector.broadcast %502 : vector<1x2xf32> to vector<6x2xf32>
    %504 = arith.mulf %15, %503 : vector<6x2xf32>
    %505 = arith.addf %501, %504 : vector<6x2xf32>
    %506 = arith.addf %505, %19 : vector<6x2xf32>
    %507 = vector.extract_strided_slice %498 {offsets = [0, 0], sizes = [4, 2], strides = [1, 1]} : vector<6x2xf32> to vector<4x2xf32>
    %508 = vector.extract_strided_slice %506 {offsets = [0, 0], sizes = [4, 2], strides = [1, 1]} : vector<6x2xf32> to vector<4x2xf32>
    %509 = arith.addf %507, %508 : vector<4x2xf32>
    %cst_84 = arith.constant 5.000000e-01 : f32
    %510 = vector.broadcast %cst_84 : f32 to vector<4x2xf32>
    %511 = arith.mulf %510, %509 : vector<4x2xf32>
    %512 = math.tanh %511 : vector<4x2xf32>
    %cst_85 = arith.constant 5.000000e-01 : f32
    %513 = vector.broadcast %cst_85 : f32 to vector<4x2xf32>
    %514 = arith.mulf %513, %512 : vector<4x2xf32>
    %cst_86 = arith.constant 5.000000e-01 : f32
    %515 = vector.broadcast %cst_86 : f32 to vector<4x2xf32>
    %516 = arith.addf %514, %515 : vector<4x2xf32>
    %517 = vector.extract_strided_slice %516 {offsets = [0, 0], sizes = [2, 2], strides = [1, 1]} : vector<4x2xf32> to vector<2x2xf32>
    %518 = vector.extract_strided_slice %516 {offsets = [2, 0], sizes = [2, 2], strides = [1, 1]} : vector<4x2xf32> to vector<2x2xf32>
    %519 = vector.extract_strided_slice %498 {offsets = [4, 0], sizes = [2, 2], strides = [1, 1]} : vector<6x2xf32> to vector<2x2xf32>
    %520 = vector.extract_strided_slice %506 {offsets = [4, 0], sizes = [2, 2], strides = [1, 1]} : vector<6x2xf32> to vector<2x2xf32>
    %521 = arith.mulf %517, %520 : vector<2x2xf32>
    %522 = arith.addf %519, %521 : vector<2x2xf32>
    %523 = math.tanh %522 : vector<2x2xf32>
    %524 = arith.subf %461, %523 : vector<2x2xf32>
    %525 = arith.mulf %518, %524 : vector<2x2xf32>
    %526 = arith.addf %523, %525 : vector<2x2xf32>
    %527 = vector.extract_strided_slice %526 {offsets = [0, 0], sizes = [1, 2], strides = [1, 1]} : vector<2x2xf32> to vector<1x2xf32>
    %528 = vector.broadcast %527 : vector<1x2xf32> to vector<6x2xf32>
    %529 = arith.mulf %24, %528 : vector<6x2xf32>
    %530 = vector.extract_strided_slice %526 {offsets = [1, 0], sizes = [1, 2], strides = [1, 1]} : vector<2x2xf32> to vector<1x2xf32>
    %531 = vector.broadcast %530 : vector<1x2xf32> to vector<6x2xf32>
    %532 = arith.mulf %27, %531 : vector<6x2xf32>
    %533 = arith.addf %529, %532 : vector<6x2xf32>
    %534 = arith.addf %533, %31 : vector<6x2xf32>
    %535 = vector.extract_strided_slice %497 {offsets = [0, 0], sizes = [1, 2], strides = [1, 1]} : vector<2x2xf32> to vector<1x2xf32>
    %536 = vector.broadcast %535 : vector<1x2xf32> to vector<6x2xf32>
    %537 = arith.mulf %36, %536 : vector<6x2xf32>
    %538 = vector.extract_strided_slice %497 {offsets = [1, 0], sizes = [1, 2], strides = [1, 1]} : vector<2x2xf32> to vector<1x2xf32>
    %539 = vector.broadcast %538 : vector<1x2xf32> to vector<6x2xf32>
    %540 = arith.mulf %39, %539 : vector<6x2xf32>
    %541 = arith.addf %537, %540 : vector<6x2xf32>
    %542 = arith.addf %541, %43 : vector<6x2xf32>
    %543 = vector.extract_strided_slice %534 {offsets = [0, 0], sizes = [4, 2], strides = [1, 1]} : vector<6x2xf32> to vector<4x2xf32>
    %544 = vector.extract_strided_slice %542 {offsets = [0, 0], sizes = [4, 2], strides = [1, 1]} : vector<6x2xf32> to vector<4x2xf32>
    %545 = arith.addf %543, %544 : vector<4x2xf32>
    %cst_87 = arith.constant 5.000000e-01 : f32
    %546 = vector.broadcast %cst_87 : f32 to vector<4x2xf32>
    %547 = arith.mulf %546, %545 : vector<4x2xf32>
    %548 = math.tanh %547 : vector<4x2xf32>
    %cst_88 = arith.constant 5.000000e-01 : f32
    %549 = vector.broadcast %cst_88 : f32 to vector<4x2xf32>
    %550 = arith.mulf %549, %548 : vector<4x2xf32>
    %cst_89 = arith.constant 5.000000e-01 : f32
    %551 = vector.broadcast %cst_89 : f32 to vector<4x2xf32>
    %552 = arith.addf %550, %551 : vector<4x2xf32>
    %553 = vector.extract_strided_slice %552 {offsets = [0, 0], sizes = [2, 2], strides = [1, 1]} : vector<4x2xf32> to vector<2x2xf32>
    %554 = vector.extract_strided_slice %552 {offsets = [2, 0], sizes = [2, 2], strides = [1, 1]} : vector<4x2xf32> to vector<2x2xf32>
    %555 = vector.extract_strided_slice %534 {offsets = [4, 0], sizes = [2, 2], strides = [1, 1]} : vector<6x2xf32> to vector<2x2xf32>
    %556 = vector.extract_strided_slice %542 {offsets = [4, 0], sizes = [2, 2], strides = [1, 1]} : vector<6x2xf32> to vector<2x2xf32>
    %557 = arith.mulf %553, %556 : vector<2x2xf32>
    %558 = arith.addf %555, %557 : vector<2x2xf32>
    %559 = math.tanh %558 : vector<2x2xf32>
    %560 = arith.subf %497, %559 : vector<2x2xf32>
    %561 = arith.mulf %554, %560 : vector<2x2xf32>
    %562 = arith.addf %559, %561 : vector<2x2xf32>
    %563 = vector.extract_strided_slice %7 {offsets = [0, 14], sizes = [6, 2], strides = [1, 1]} : vector<6x16xf32> to vector<6x2xf32>
    %564 = vector.extract_strided_slice %526 {offsets = [0, 0], sizes = [1, 2], strides = [1, 1]} : vector<2x2xf32> to vector<1x2xf32>
    %565 = vector.broadcast %564 : vector<1x2xf32> to vector<6x2xf32>
    %566 = arith.mulf %12, %565 : vector<6x2xf32>
    %567 = vector.extract_strided_slice %526 {offsets = [1, 0], sizes = [1, 2], strides = [1, 1]} : vector<2x2xf32> to vector<1x2xf32>
    %568 = vector.broadcast %567 : vector<1x2xf32> to vector<6x2xf32>
    %569 = arith.mulf %15, %568 : vector<6x2xf32>
    %570 = arith.addf %566, %569 : vector<6x2xf32>
    %571 = arith.addf %570, %19 : vector<6x2xf32>
    %572 = vector.extract_strided_slice %563 {offsets = [0, 0], sizes = [4, 2], strides = [1, 1]} : vector<6x2xf32> to vector<4x2xf32>
    %573 = vector.extract_strided_slice %571 {offsets = [0, 0], sizes = [4, 2], strides = [1, 1]} : vector<6x2xf32> to vector<4x2xf32>
    %574 = arith.addf %572, %573 : vector<4x2xf32>
    %cst_90 = arith.constant 5.000000e-01 : f32
    %575 = vector.broadcast %cst_90 : f32 to vector<4x2xf32>
    %576 = arith.mulf %575, %574 : vector<4x2xf32>
    %577 = math.tanh %576 : vector<4x2xf32>
    %cst_91 = arith.constant 5.000000e-01 : f32
    %578 = vector.broadcast %cst_91 : f32 to vector<4x2xf32>
    %579 = arith.mulf %578, %577 : vector<4x2xf32>
    %cst_92 = arith.constant 5.000000e-01 : f32
    %580 = vector.broadcast %cst_92 : f32 to vector<4x2xf32>
    %581 = arith.addf %579, %580 : vector<4x2xf32>
    %582 = vector.extract_strided_slice %581 {offsets = [0, 0], sizes = [2, 2], strides = [1, 1]} : vector<4x2xf32> to vector<2x2xf32>
    %583 = vector.extract_strided_slice %581 {offsets = [2, 0], sizes = [2, 2], strides = [1, 1]} : vector<4x2xf32> to vector<2x2xf32>
    %584 = vector.extract_strided_slice %563 {offsets = [4, 0], sizes = [2, 2], strides = [1, 1]} : vector<6x2xf32> to vector<2x2xf32>
    %585 = vector.extract_strided_slice %571 {offsets = [4, 0], sizes = [2, 2], strides = [1, 1]} : vector<6x2xf32> to vector<2x2xf32>
    %586 = arith.mulf %582, %585 : vector<2x2xf32>
    %587 = arith.addf %584, %586 : vector<2x2xf32>
    %588 = math.tanh %587 : vector<2x2xf32>
    %589 = arith.subf %526, %588 : vector<2x2xf32>
    %590 = arith.mulf %583, %589 : vector<2x2xf32>
    %591 = arith.addf %588, %590 : vector<2x2xf32>
    %592 = vector.extract_strided_slice %591 {offsets = [0, 0], sizes = [1, 2], strides = [1, 1]} : vector<2x2xf32> to vector<1x2xf32>
    %593 = vector.broadcast %592 : vector<1x2xf32> to vector<6x2xf32>
    %594 = arith.mulf %24, %593 : vector<6x2xf32>
    %595 = vector.extract_strided_slice %591 {offsets = [1, 0], sizes = [1, 2], strides = [1, 1]} : vector<2x2xf32> to vector<1x2xf32>
    %596 = vector.broadcast %595 : vector<1x2xf32> to vector<6x2xf32>
    %597 = arith.mulf %27, %596 : vector<6x2xf32>
    %598 = arith.addf %594, %597 : vector<6x2xf32>
    %599 = arith.addf %598, %31 : vector<6x2xf32>
    %600 = vector.extract_strided_slice %562 {offsets = [0, 0], sizes = [1, 2], strides = [1, 1]} : vector<2x2xf32> to vector<1x2xf32>
    %601 = vector.broadcast %600 : vector<1x2xf32> to vector<6x2xf32>
    %602 = arith.mulf %36, %601 : vector<6x2xf32>
    %603 = vector.extract_strided_slice %562 {offsets = [1, 0], sizes = [1, 2], strides = [1, 1]} : vector<2x2xf32> to vector<1x2xf32>
    %604 = vector.broadcast %603 : vector<1x2xf32> to vector<6x2xf32>
    %605 = arith.mulf %39, %604 : vector<6x2xf32>
    %606 = arith.addf %602, %605 : vector<6x2xf32>
    %607 = arith.addf %606, %43 : vector<6x2xf32>
    %608 = vector.extract_strided_slice %599 {offsets = [0, 0], sizes = [4, 2], strides = [1, 1]} : vector<6x2xf32> to vector<4x2xf32>
    %609 = vector.extract_strided_slice %607 {offsets = [0, 0], sizes = [4, 2], strides = [1, 1]} : vector<6x2xf32> to vector<4x2xf32>
    %610 = arith.addf %608, %609 : vector<4x2xf32>
    %cst_93 = arith.constant 5.000000e-01 : f32
    %611 = vector.broadcast %cst_93 : f32 to vector<4x2xf32>
    %612 = arith.mulf %611, %610 : vector<4x2xf32>
    %613 = math.tanh %612 : vector<4x2xf32>
    %cst_94 = arith.constant 5.000000e-01 : f32
    %614 = vector.broadcast %cst_94 : f32 to vector<4x2xf32>
    %615 = arith.mulf %614, %613 : vector<4x2xf32>
    %cst_95 = arith.constant 5.000000e-01 : f32
    %616 = vector.broadcast %cst_95 : f32 to vector<4x2xf32>
    %617 = arith.addf %615, %616 : vector<4x2xf32>
    %618 = vector.extract_strided_slice %617 {offsets = [0, 0], sizes = [2, 2], strides = [1, 1]} : vector<4x2xf32> to vector<2x2xf32>
    %619 = vector.extract_strided_slice %617 {offsets = [2, 0], sizes = [2, 2], strides = [1, 1]} : vector<4x2xf32> to vector<2x2xf32>
    %620 = vector.extract_strided_slice %599 {offsets = [4, 0], sizes = [2, 2], strides = [1, 1]} : vector<6x2xf32> to vector<2x2xf32>
    %621 = vector.extract_strided_slice %607 {offsets = [4, 0], sizes = [2, 2], strides = [1, 1]} : vector<6x2xf32> to vector<2x2xf32>
    %622 = arith.mulf %618, %621 : vector<2x2xf32>
    %623 = arith.addf %620, %622 : vector<2x2xf32>
    %624 = math.tanh %623 : vector<2x2xf32>
    %625 = arith.subf %562, %624 : vector<2x2xf32>
    %626 = arith.mulf %619, %625 : vector<2x2xf32>
    %627 = arith.addf %624, %626 : vector<2x2xf32>
    %628 = vector.extract_strided_slice %0 {offsets = [0, 14], sizes = [2, 2], strides = [1, 1]} : vector<16x16xf32> to vector<2x2xf32>
    %629 = vector.extract_strided_slice %628 {offsets = [0, 0], sizes = [1, 2], strides = [1, 1]} : vector<2x2xf32> to vector<1x2xf32>
    %630 = vector.broadcast %629 : vector<1x2xf32> to vector<6x2xf32>
    %631 = arith.mulf %48, %630 : vector<6x2xf32>
    %632 = vector.extract_strided_slice %628 {offsets = [1, 0], sizes = [1, 2], strides = [1, 1]} : vector<2x2xf32> to vector<1x2xf32>
    %633 = vector.broadcast %632 : vector<1x2xf32> to vector<6x2xf32>
    %634 = arith.mulf %51, %633 : vector<6x2xf32>
    %635 = arith.addf %631, %634 : vector<6x2xf32>
    %636 = arith.addf %635, %55 : vector<6x2xf32>
    %637 = vector.extract_strided_slice %591 {offsets = [0, 0], sizes = [1, 2], strides = [1, 1]} : vector<2x2xf32> to vector<1x2xf32>
    %638 = vector.broadcast %637 : vector<1x2xf32> to vector<6x2xf32>
    %639 = arith.mulf %60, %638 : vector<6x2xf32>
    %640 = vector.extract_strided_slice %591 {offsets = [1, 0], sizes = [1, 2], strides = [1, 1]} : vector<2x2xf32> to vector<1x2xf32>
    %641 = vector.broadcast %640 : vector<1x2xf32> to vector<6x2xf32>
    %642 = arith.mulf %63, %641 : vector<6x2xf32>
    %643 = arith.addf %639, %642 : vector<6x2xf32>
    %644 = arith.addf %643, %67 : vector<6x2xf32>
    %645 = vector.extract_strided_slice %636 {offsets = [0, 0], sizes = [4, 2], strides = [1, 1]} : vector<6x2xf32> to vector<4x2xf32>
    %646 = vector.extract_strided_slice %644 {offsets = [0, 0], sizes = [4, 2], strides = [1, 1]} : vector<6x2xf32> to vector<4x2xf32>
    %647 = arith.addf %645, %646 : vector<4x2xf32>
    %cst_96 = arith.constant 5.000000e-01 : f32
    %648 = vector.broadcast %cst_96 : f32 to vector<4x2xf32>
    %649 = arith.mulf %648, %647 : vector<4x2xf32>
    %650 = math.tanh %649 : vector<4x2xf32>
    %cst_97 = arith.constant 5.000000e-01 : f32
    %651 = vector.broadcast %cst_97 : f32 to vector<4x2xf32>
    %652 = arith.mulf %651, %650 : vector<4x2xf32>
    %cst_98 = arith.constant 5.000000e-01 : f32
    %653 = vector.broadcast %cst_98 : f32 to vector<4x2xf32>
    %654 = arith.addf %652, %653 : vector<4x2xf32>
    %655 = vector.extract_strided_slice %654 {offsets = [0, 0], sizes = [2, 2], strides = [1, 1]} : vector<4x2xf32> to vector<2x2xf32>
    %656 = vector.extract_strided_slice %654 {offsets = [2, 0], sizes = [2, 2], strides = [1, 1]} : vector<4x2xf32> to vector<2x2xf32>
    %657 = vector.extract_strided_slice %636 {offsets = [4, 0], sizes = [2, 2], strides = [1, 1]} : vector<6x2xf32> to vector<2x2xf32>
    %658 = vector.extract_strided_slice %644 {offsets = [4, 0], sizes = [2, 2], strides = [1, 1]} : vector<6x2xf32> to vector<2x2xf32>
    %659 = arith.mulf %655, %658 : vector<2x2xf32>
    %660 = arith.addf %657, %659 : vector<2x2xf32>
    %661 = math.tanh %660 : vector<2x2xf32>
    %662 = arith.subf %591, %661 : vector<2x2xf32>
    %663 = arith.mulf %656, %662 : vector<2x2xf32>
    %664 = arith.addf %661, %663 : vector<2x2xf32>
    %665 = vector.extract_strided_slice %664 {offsets = [0, 0], sizes = [1, 2], strides = [1, 1]} : vector<2x2xf32> to vector<1x2xf32>
    %666 = vector.broadcast %665 : vector<1x2xf32> to vector<6x2xf32>
    %667 = arith.mulf %72, %666 : vector<6x2xf32>
    %668 = vector.extract_strided_slice %664 {offsets = [1, 0], sizes = [1, 2], strides = [1, 1]} : vector<2x2xf32> to vector<1x2xf32>
    %669 = vector.broadcast %668 : vector<1x2xf32> to vector<6x2xf32>
    %670 = arith.mulf %75, %669 : vector<6x2xf32>
    %671 = arith.addf %667, %670 : vector<6x2xf32>
    %672 = arith.addf %671, %79 : vector<6x2xf32>
    %673 = vector.extract_strided_slice %627 {offsets = [0, 0], sizes = [1, 2], strides = [1, 1]} : vector<2x2xf32> to vector<1x2xf32>
    %674 = vector.broadcast %673 : vector<1x2xf32> to vector<6x2xf32>
    %675 = arith.mulf %84, %674 : vector<6x2xf32>
    %676 = vector.extract_strided_slice %627 {offsets = [1, 0], sizes = [1, 2], strides = [1, 1]} : vector<2x2xf32> to vector<1x2xf32>
    %677 = vector.broadcast %676 : vector<1x2xf32> to vector<6x2xf32>
    %678 = arith.mulf %87, %677 : vector<6x2xf32>
    %679 = arith.addf %675, %678 : vector<6x2xf32>
    %680 = arith.addf %679, %91 : vector<6x2xf32>
    %681 = vector.extract_strided_slice %672 {offsets = [0, 0], sizes = [4, 2], strides = [1, 1]} : vector<6x2xf32> to vector<4x2xf32>
    %682 = vector.extract_strided_slice %680 {offsets = [0, 0], sizes = [4, 2], strides = [1, 1]} : vector<6x2xf32> to vector<4x2xf32>
    %683 = arith.addf %681, %682 : vector<4x2xf32>
    %cst_99 = arith.constant 5.000000e-01 : f32
    %684 = vector.broadcast %cst_99 : f32 to vector<4x2xf32>
    %685 = arith.mulf %684, %683 : vector<4x2xf32>
    %686 = math.tanh %685 : vector<4x2xf32>
    %cst_100 = arith.constant 5.000000e-01 : f32
    %687 = vector.broadcast %cst_100 : f32 to vector<4x2xf32>
    %688 = arith.mulf %687, %686 : vector<4x2xf32>
    %cst_101 = arith.constant 5.000000e-01 : f32
    %689 = vector.broadcast %cst_101 : f32 to vector<4x2xf32>
    %690 = arith.addf %688, %689 : vector<4x2xf32>
    %691 = vector.extract_strided_slice %690 {offsets = [0, 0], sizes = [2, 2], strides = [1, 1]} : vector<4x2xf32> to vector<2x2xf32>
    %692 = vector.extract_strided_slice %690 {offsets = [2, 0], sizes = [2, 2], strides = [1, 1]} : vector<4x2xf32> to vector<2x2xf32>
    %693 = vector.extract_strided_slice %672 {offsets = [4, 0], sizes = [2, 2], strides = [1, 1]} : vector<6x2xf32> to vector<2x2xf32>
    %694 = vector.extract_strided_slice %680 {offsets = [4, 0], sizes = [2, 2], strides = [1, 1]} : vector<6x2xf32> to vector<2x2xf32>
    %695 = arith.mulf %691, %694 : vector<2x2xf32>
    %696 = arith.addf %693, %695 : vector<2x2xf32>
    %697 = math.tanh %696 : vector<2x2xf32>
    %698 = arith.subf %627, %697 : vector<2x2xf32>
    %699 = arith.mulf %692, %698 : vector<2x2xf32>
    %700 = arith.addf %697, %699 : vector<2x2xf32>
    %701 = vector.extract_strided_slice %700 {offsets = [0, 0], sizes = [1, 2], strides = [1, 1]} : vector<2x2xf32> to vector<1x2xf32>
    %702 = vector.broadcast %701 : vector<1x2xf32> to vector<2x2xf32>
    %703 = arith.mulf %97, %702 : vector<2x2xf32>
    %704 = vector.extract_strided_slice %700 {offsets = [1, 0], sizes = [1, 2], strides = [1, 1]} : vector<2x2xf32> to vector<1x2xf32>
    %705 = vector.broadcast %704 : vector<1x2xf32> to vector<2x2xf32>
    %706 = arith.mulf %100, %705 : vector<2x2xf32>
    %707 = arith.addf %703, %706 : vector<2x2xf32>
    %708 = arith.addf %707, %105 : vector<2x2xf32>
    %709 = arith.addf %708, %628 : vector<2x2xf32>
    %710 = vector.extract_strided_slice %709 {offsets = [0, 0], sizes = [1, 2], strides = [1, 1]} : vector<2x2xf32> to vector<1x2xf32>
    %711 = vector.broadcast %710 : vector<1x2xf32> to vector<6x2xf32>
    %712 = arith.mulf %48, %711 : vector<6x2xf32>
    %713 = vector.extract_strided_slice %709 {offsets = [1, 0], sizes = [1, 2], strides = [1, 1]} : vector<2x2xf32> to vector<1x2xf32>
    %714 = vector.broadcast %713 : vector<1x2xf32> to vector<6x2xf32>
    %715 = arith.mulf %51, %714 : vector<6x2xf32>
    %716 = arith.addf %712, %715 : vector<6x2xf32>
    %717 = arith.addf %716, %55 : vector<6x2xf32>
    %718 = vector.extract_strided_slice %664 {offsets = [0, 0], sizes = [1, 2], strides = [1, 1]} : vector<2x2xf32> to vector<1x2xf32>
    %719 = vector.broadcast %718 : vector<1x2xf32> to vector<6x2xf32>
    %720 = arith.mulf %60, %719 : vector<6x2xf32>
    %721 = vector.extract_strided_slice %664 {offsets = [1, 0], sizes = [1, 2], strides = [1, 1]} : vector<2x2xf32> to vector<1x2xf32>
    %722 = vector.broadcast %721 : vector<1x2xf32> to vector<6x2xf32>
    %723 = arith.mulf %63, %722 : vector<6x2xf32>
    %724 = arith.addf %720, %723 : vector<6x2xf32>
    %725 = arith.addf %724, %67 : vector<6x2xf32>
    %726 = vector.extract_strided_slice %717 {offsets = [0, 0], sizes = [4, 2], strides = [1, 1]} : vector<6x2xf32> to vector<4x2xf32>
    %727 = vector.extract_strided_slice %725 {offsets = [0, 0], sizes = [4, 2], strides = [1, 1]} : vector<6x2xf32> to vector<4x2xf32>
    %728 = arith.addf %726, %727 : vector<4x2xf32>
    %cst_102 = arith.constant 5.000000e-01 : f32
    %729 = vector.broadcast %cst_102 : f32 to vector<4x2xf32>
    %730 = arith.mulf %729, %728 : vector<4x2xf32>
    %731 = math.tanh %730 : vector<4x2xf32>
    %cst_103 = arith.constant 5.000000e-01 : f32
    %732 = vector.broadcast %cst_103 : f32 to vector<4x2xf32>
    %733 = arith.mulf %732, %731 : vector<4x2xf32>
    %cst_104 = arith.constant 5.000000e-01 : f32
    %734 = vector.broadcast %cst_104 : f32 to vector<4x2xf32>
    %735 = arith.addf %733, %734 : vector<4x2xf32>
    %736 = vector.extract_strided_slice %735 {offsets = [0, 0], sizes = [2, 2], strides = [1, 1]} : vector<4x2xf32> to vector<2x2xf32>
    %737 = vector.extract_strided_slice %735 {offsets = [2, 0], sizes = [2, 2], strides = [1, 1]} : vector<4x2xf32> to vector<2x2xf32>
    %738 = vector.extract_strided_slice %717 {offsets = [4, 0], sizes = [2, 2], strides = [1, 1]} : vector<6x2xf32> to vector<2x2xf32>
    %739 = vector.extract_strided_slice %725 {offsets = [4, 0], sizes = [2, 2], strides = [1, 1]} : vector<6x2xf32> to vector<2x2xf32>
    %740 = arith.mulf %736, %739 : vector<2x2xf32>
    %741 = arith.addf %738, %740 : vector<2x2xf32>
    %742 = math.tanh %741 : vector<2x2xf32>
    %743 = arith.subf %664, %742 : vector<2x2xf32>
    %744 = arith.mulf %737, %743 : vector<2x2xf32>
    %745 = arith.addf %742, %744 : vector<2x2xf32>
    %746 = vector.extract_strided_slice %745 {offsets = [0, 0], sizes = [1, 2], strides = [1, 1]} : vector<2x2xf32> to vector<1x2xf32>
    %747 = vector.broadcast %746 : vector<1x2xf32> to vector<6x2xf32>
    %748 = arith.mulf %72, %747 : vector<6x2xf32>
    %749 = vector.extract_strided_slice %745 {offsets = [1, 0], sizes = [1, 2], strides = [1, 1]} : vector<2x2xf32> to vector<1x2xf32>
    %750 = vector.broadcast %749 : vector<1x2xf32> to vector<6x2xf32>
    %751 = arith.mulf %75, %750 : vector<6x2xf32>
    %752 = arith.addf %748, %751 : vector<6x2xf32>
    %753 = arith.addf %752, %79 : vector<6x2xf32>
    %754 = vector.extract_strided_slice %700 {offsets = [0, 0], sizes = [1, 2], strides = [1, 1]} : vector<2x2xf32> to vector<1x2xf32>
    %755 = vector.broadcast %754 : vector<1x2xf32> to vector<6x2xf32>
    %756 = arith.mulf %84, %755 : vector<6x2xf32>
    %757 = vector.extract_strided_slice %700 {offsets = [1, 0], sizes = [1, 2], strides = [1, 1]} : vector<2x2xf32> to vector<1x2xf32>
    %758 = vector.broadcast %757 : vector<1x2xf32> to vector<6x2xf32>
    %759 = arith.mulf %87, %758 : vector<6x2xf32>
    %760 = arith.addf %756, %759 : vector<6x2xf32>
    %761 = arith.addf %760, %91 : vector<6x2xf32>
    %762 = vector.extract_strided_slice %753 {offsets = [0, 0], sizes = [4, 2], strides = [1, 1]} : vector<6x2xf32> to vector<4x2xf32>
    %763 = vector.extract_strided_slice %761 {offsets = [0, 0], sizes = [4, 2], strides = [1, 1]} : vector<6x2xf32> to vector<4x2xf32>
    %764 = arith.addf %762, %763 : vector<4x2xf32>
    %cst_105 = arith.constant 5.000000e-01 : f32
    %765 = vector.broadcast %cst_105 : f32 to vector<4x2xf32>
    %766 = arith.mulf %765, %764 : vector<4x2xf32>
    %767 = math.tanh %766 : vector<4x2xf32>
    %cst_106 = arith.constant 5.000000e-01 : f32
    %768 = vector.broadcast %cst_106 : f32 to vector<4x2xf32>
    %769 = arith.mulf %768, %767 : vector<4x2xf32>
    %cst_107 = arith.constant 5.000000e-01 : f32
    %770 = vector.broadcast %cst_107 : f32 to vector<4x2xf32>
    %771 = arith.addf %769, %770 : vector<4x2xf32>
    %772 = vector.extract_strided_slice %771 {offsets = [0, 0], sizes = [2, 2], strides = [1, 1]} : vector<4x2xf32> to vector<2x2xf32>
    %773 = vector.extract_strided_slice %771 {offsets = [2, 0], sizes = [2, 2], strides = [1, 1]} : vector<4x2xf32> to vector<2x2xf32>
    %774 = vector.extract_strided_slice %753 {offsets = [4, 0], sizes = [2, 2], strides = [1, 1]} : vector<6x2xf32> to vector<2x2xf32>
    %775 = vector.extract_strided_slice %761 {offsets = [4, 0], sizes = [2, 2], strides = [1, 1]} : vector<6x2xf32> to vector<2x2xf32>
    %776 = arith.mulf %772, %775 : vector<2x2xf32>
    %777 = arith.addf %774, %776 : vector<2x2xf32>
    %778 = math.tanh %777 : vector<2x2xf32>
    %779 = arith.subf %700, %778 : vector<2x2xf32>
    %780 = arith.mulf %773, %779 : vector<2x2xf32>
    %781 = arith.addf %778, %780 : vector<2x2xf32>
    %782 = vector.extract_strided_slice %781 {offsets = [0, 0], sizes = [1, 2], strides = [1, 1]} : vector<2x2xf32> to vector<1x2xf32>
    %783 = vector.broadcast %782 : vector<1x2xf32> to vector<2x2xf32>
    %784 = arith.mulf %97, %783 : vector<2x2xf32>
    %785 = vector.extract_strided_slice %781 {offsets = [1, 0], sizes = [1, 2], strides = [1, 1]} : vector<2x2xf32> to vector<1x2xf32>
    %786 = vector.broadcast %785 : vector<1x2xf32> to vector<2x2xf32>
    %787 = arith.mulf %100, %786 : vector<2x2xf32>
    %788 = arith.addf %784, %787 : vector<2x2xf32>
    %789 = arith.addf %788, %105 : vector<2x2xf32>
    %790 = arith.addf %789, %709 : vector<2x2xf32>
    %791 = vector.extract_strided_slice %790 {offsets = [0, 0], sizes = [1, 2], strides = [1, 1]} : vector<2x2xf32> to vector<1x2xf32>
    %792 = vector.broadcast %791 : vector<1x2xf32> to vector<6x2xf32>
    %793 = arith.mulf %48, %792 : vector<6x2xf32>
    %794 = vector.extract_strided_slice %790 {offsets = [1, 0], sizes = [1, 2], strides = [1, 1]} : vector<2x2xf32> to vector<1x2xf32>
    %795 = vector.broadcast %794 : vector<1x2xf32> to vector<6x2xf32>
    %796 = arith.mulf %51, %795 : vector<6x2xf32>
    %797 = arith.addf %793, %796 : vector<6x2xf32>
    %798 = arith.addf %797, %55 : vector<6x2xf32>
    %799 = vector.extract_strided_slice %745 {offsets = [0, 0], sizes = [1, 2], strides = [1, 1]} : vector<2x2xf32> to vector<1x2xf32>
    %800 = vector.broadcast %799 : vector<1x2xf32> to vector<6x2xf32>
    %801 = arith.mulf %60, %800 : vector<6x2xf32>
    %802 = vector.extract_strided_slice %745 {offsets = [1, 0], sizes = [1, 2], strides = [1, 1]} : vector<2x2xf32> to vector<1x2xf32>
    %803 = vector.broadcast %802 : vector<1x2xf32> to vector<6x2xf32>
    %804 = arith.mulf %63, %803 : vector<6x2xf32>
    %805 = arith.addf %801, %804 : vector<6x2xf32>
    %806 = arith.addf %805, %67 : vector<6x2xf32>
    %807 = vector.extract_strided_slice %798 {offsets = [0, 0], sizes = [4, 2], strides = [1, 1]} : vector<6x2xf32> to vector<4x2xf32>
    %808 = vector.extract_strided_slice %806 {offsets = [0, 0], sizes = [4, 2], strides = [1, 1]} : vector<6x2xf32> to vector<4x2xf32>
    %809 = arith.addf %807, %808 : vector<4x2xf32>
    %cst_108 = arith.constant 5.000000e-01 : f32
    %810 = vector.broadcast %cst_108 : f32 to vector<4x2xf32>
    %811 = arith.mulf %810, %809 : vector<4x2xf32>
    %812 = math.tanh %811 : vector<4x2xf32>
    %cst_109 = arith.constant 5.000000e-01 : f32
    %813 = vector.broadcast %cst_109 : f32 to vector<4x2xf32>
    %814 = arith.mulf %813, %812 : vector<4x2xf32>
    %cst_110 = arith.constant 5.000000e-01 : f32
    %815 = vector.broadcast %cst_110 : f32 to vector<4x2xf32>
    %816 = arith.addf %814, %815 : vector<4x2xf32>
    %817 = vector.extract_strided_slice %816 {offsets = [0, 0], sizes = [2, 2], strides = [1, 1]} : vector<4x2xf32> to vector<2x2xf32>
    %818 = vector.extract_strided_slice %816 {offsets = [2, 0], sizes = [2, 2], strides = [1, 1]} : vector<4x2xf32> to vector<2x2xf32>
    %819 = vector.extract_strided_slice %798 {offsets = [4, 0], sizes = [2, 2], strides = [1, 1]} : vector<6x2xf32> to vector<2x2xf32>
    %820 = vector.extract_strided_slice %806 {offsets = [4, 0], sizes = [2, 2], strides = [1, 1]} : vector<6x2xf32> to vector<2x2xf32>
    %821 = arith.mulf %817, %820 : vector<2x2xf32>
    %822 = arith.addf %819, %821 : vector<2x2xf32>
    %823 = math.tanh %822 : vector<2x2xf32>
    %824 = arith.subf %745, %823 : vector<2x2xf32>
    %825 = arith.mulf %818, %824 : vector<2x2xf32>
    %826 = arith.addf %823, %825 : vector<2x2xf32>
    %827 = vector.extract_strided_slice %826 {offsets = [0, 0], sizes = [1, 2], strides = [1, 1]} : vector<2x2xf32> to vector<1x2xf32>
    %828 = vector.broadcast %827 : vector<1x2xf32> to vector<6x2xf32>
    %829 = arith.mulf %72, %828 : vector<6x2xf32>
    %830 = vector.extract_strided_slice %826 {offsets = [1, 0], sizes = [1, 2], strides = [1, 1]} : vector<2x2xf32> to vector<1x2xf32>
    %831 = vector.broadcast %830 : vector<1x2xf32> to vector<6x2xf32>
    %832 = arith.mulf %75, %831 : vector<6x2xf32>
    %833 = arith.addf %829, %832 : vector<6x2xf32>
    %834 = arith.addf %833, %79 : vector<6x2xf32>
    %835 = vector.extract_strided_slice %781 {offsets = [0, 0], sizes = [1, 2], strides = [1, 1]} : vector<2x2xf32> to vector<1x2xf32>
    %836 = vector.broadcast %835 : vector<1x2xf32> to vector<6x2xf32>
    %837 = arith.mulf %84, %836 : vector<6x2xf32>
    %838 = vector.extract_strided_slice %781 {offsets = [1, 0], sizes = [1, 2], strides = [1, 1]} : vector<2x2xf32> to vector<1x2xf32>
    %839 = vector.broadcast %838 : vector<1x2xf32> to vector<6x2xf32>
    %840 = arith.mulf %87, %839 : vector<6x2xf32>
    %841 = arith.addf %837, %840 : vector<6x2xf32>
    %842 = arith.addf %841, %91 : vector<6x2xf32>
    %843 = vector.extract_strided_slice %834 {offsets = [0, 0], sizes = [4, 2], strides = [1, 1]} : vector<6x2xf32> to vector<4x2xf32>
    %844 = vector.extract_strided_slice %842 {offsets = [0, 0], sizes = [4, 2], strides = [1, 1]} : vector<6x2xf32> to vector<4x2xf32>
    %845 = arith.addf %843, %844 : vector<4x2xf32>
    %cst_111 = arith.constant 5.000000e-01 : f32
    %846 = vector.broadcast %cst_111 : f32 to vector<4x2xf32>
    %847 = arith.mulf %846, %845 : vector<4x2xf32>
    %848 = math.tanh %847 : vector<4x2xf32>
    %cst_112 = arith.constant 5.000000e-01 : f32
    %849 = vector.broadcast %cst_112 : f32 to vector<4x2xf32>
    %850 = arith.mulf %849, %848 : vector<4x2xf32>
    %cst_113 = arith.constant 5.000000e-01 : f32
    %851 = vector.broadcast %cst_113 : f32 to vector<4x2xf32>
    %852 = arith.addf %850, %851 : vector<4x2xf32>
    %853 = vector.extract_strided_slice %852 {offsets = [0, 0], sizes = [2, 2], strides = [1, 1]} : vector<4x2xf32> to vector<2x2xf32>
    %854 = vector.extract_strided_slice %852 {offsets = [2, 0], sizes = [2, 2], strides = [1, 1]} : vector<4x2xf32> to vector<2x2xf32>
    %855 = vector.extract_strided_slice %834 {offsets = [4, 0], sizes = [2, 2], strides = [1, 1]} : vector<6x2xf32> to vector<2x2xf32>
    %856 = vector.extract_strided_slice %842 {offsets = [4, 0], sizes = [2, 2], strides = [1, 1]} : vector<6x2xf32> to vector<2x2xf32>
    %857 = arith.mulf %853, %856 : vector<2x2xf32>
    %858 = arith.addf %855, %857 : vector<2x2xf32>
    %859 = math.tanh %858 : vector<2x2xf32>
    %860 = arith.subf %781, %859 : vector<2x2xf32>
    %861 = arith.mulf %854, %860 : vector<2x2xf32>
    %862 = arith.addf %859, %861 : vector<2x2xf32>
    %863 = vector.extract_strided_slice %862 {offsets = [0, 0], sizes = [1, 2], strides = [1, 1]} : vector<2x2xf32> to vector<1x2xf32>
    %864 = vector.broadcast %863 : vector<1x2xf32> to vector<2x2xf32>
    %865 = arith.mulf %97, %864 : vector<2x2xf32>
    %866 = vector.extract_strided_slice %862 {offsets = [1, 0], sizes = [1, 2], strides = [1, 1]} : vector<2x2xf32> to vector<1x2xf32>
    %867 = vector.broadcast %866 : vector<1x2xf32> to vector<2x2xf32>
    %868 = arith.mulf %100, %867 : vector<2x2xf32>
    %869 = arith.addf %865, %868 : vector<2x2xf32>
    %870 = arith.addf %869, %105 : vector<2x2xf32>
    %871 = arith.addf %870, %790 : vector<2x2xf32>
    %872 = tpu.concatenate %709, %790, %871 in 0 : vector<2x2xf32>, vector<2x2xf32>, vector<2x2xf32> -> vector<6x2xf32>
    %c0_114 = arith.constant 0 : index
    %c0_115 = arith.constant 0 : index
    %873 = vector.load %arg4[%c0_114, %c0_115] : memref<6x2xf32, #tpu.memory_space<vmem>>, vector<6x2xf32>
    tpu.vector_store %arg4[%c0_114, %c0_115], %872 {strides = array<i32>} : memref<6x2xf32, #tpu.memory_space<vmem>>, vector<6x2xf32>,
    return
  }
}

</mosaic_0001>

<bundles_post_ra>
// kernel: tpu_custom_call.1
= control target key start
LH: loop header
LB: loop body
LE: loop exit
PB: predicated region body
PF: predicated region fallthrough
CT: control target
= control target key end

     0   :  { %v1420_v0 = vmov 0.0|0.0   ;;  %vm1421_vm0 = vmmov 0   ;;  %v1422_v3 = vmov 0.0   ;;  %v1423_v5 = vmov 0   ;;  %s1426_s9 = smov 126   ;;  %s1872_s0 = inlined_call_operand.vmem [shape: f32[16,16], index: 0, kind: input, shape index: {}]   ;;  %s1873_s2 = inlined_call_operand.vmem [shape: f32[8,6,2], index: 2, kind: input, shape index: {}]   ;;  %s1874_s3 = inlined_call_operand.vmem [shape: f32[9,6,1], index: 3, kind: input, shape index: {}]   ;;  %s1875_s1 = inlined_call_operand.vmem [shape: f32[8,16], index: 1, kind: input, shape index: {}]   ;;  %s1876_s4 = inlined_call_operand.vmem [shape: f32[6,2], index: 4, kind: output, shape index: {}]  }
   0x1   :  { %1309 = vmatprep.subr.bf16.mxu0 %v1420_v0  ;;  %v17_v1 = vld [vmem:[%s1872_s0] sm:$0xff]  ;;  %v18_v2 = vld [vmem:[%s1872_s0 + $0x8] sm:$0xff]  ;;  %1306 = vmatprep.mubr.msk.f32.mxu0 %vm1421_vm0, %v1422_v3  ;;  %vm20_vm1 = vcmask 130048   ;;  %v1424_v10 = vmov 1   ;;  %v271_v31 = vlaneseq  ;;  %v1287_v49 = vld [vmem:[%s1873_s2 + $0x10] sm:$0x3f] }
   0x2   :  { %v1310_v4 = vpack.c.bf16 %v18_v2, %v17_v1  ;;  %1320 = vset.pattern.permute.xlu0 %v1423_v5  ;;  %v101_v6 = vld [vmem:[%s1873_s2] sm:$0x3f]  ;;  %1322 = vset.pattern.permute.xlu1 %v1423_v5  ;;  %v1284_v9 = vld [vmem:[%s1874_s3 + $0x8] sm:$0x3f]  ;;  %v1286_v50 = vld [vmem:[%s1874_s3 + $0x10] sm:$0x3f] }
   0x3   :  { %v94_v7 = vld [vmem:[%s1874_s3] sm:$0x3f]  ;;  %104 = vperm.xlu0 %1320, %v101_v6   ;;  %v1487_v35 = vshrl.u32 %v271_v31, 7  ;;  %v1285_v48 = vld [vmem:[%s1873_s2 + $0x8] sm:$0x3f]  ;;  %vm1269_vm2 = vcmask 1041408  }
   0x4   :  { %97 = vperm.xlu1 %1322, %v94_v7   ;;  %1311 = vmatpush3.bf16.msra.mxu0 %v1310_v4  ;;  %v19_v8 = vld [vmem:[%s1875_s1] sm:$0xff]  ;;  %s1425_s1 = smov 2   ;;  %v1288_v51 = vld [vmem:[%s1874_s3 + $0x18] sm:$0x3f]  ;;  %vm1271_vm3 = vcmask 1043456   ;;  %vm1277_vm4 = vcmask 13312  }
   0x5   :  { %v1490_v38 = vsub.s32 4, %v1487_v35  ;;  %v1493_v39 = vsub.s32 5, %v1487_v35 }
   0x7   :  { %1307 = vmatmul.mubr.msk.f32.vlgmr.msra.gmra.mrb[0].mxu0 %vm20_vm1, %v19_v8  ;;  %1321 = vset.pattern.permute.xlu0 %v1424_v10 }
   0x8   :  { %108 = vperm.xlu0 %1321, %v101_v6   ;;  %115 = vperm.xlu1 %1322, %v1284_v9  }
  0x82   :  { %v1474_v11 = vpop.permute.xlu0 %104 }
  0x83   :  { %v98_v13 = vpop.permute.xlu1 %97  ;;  %v244_v14 = vmul.f32 0.0, %v1474_v11 }
  0x87   :  { %v1476_v12 = vpop.permute.xlu0 %108  ;;  %v1480_v17 = vpop.permute.xlu1 %115 }
  0x88   :  { %v245_v15 = vmul.f32 0.0, %v1476_v12 }
  0x8a   :  { %v246_v16 = vadd.f32 %v245_v15, %v244_v14 }
  0x8c   :  { %v247_v19 = vadd.f32 %v246_v16, %v1480_v17 }
  0x8e   :  { %v254_v26 = vrot.slane %v247_v19, 4 }
  0xda   :  { %v90_v18 = vpop.f32.mrb[0].mxu0 }
  0xdb   :  { %v1483_v20 = vadd.f32 %v98_v13, %v90_v18  ;;  %v1308_v21 = vpop.f32.mrb[1].mxu0 }
  0xdd   :  { %v248_v22 = vadd.f32 %v247_v19, %v1483_v20 }
  0xdf   :  { %v249_v23 = vmul.f32 0.5, %v248_v22 }
  0xe1   :  { %1331 = vtanh.f32 %v249_v23 }
  0xeb   :  { %v1332_v24 = vpop.eup %1331 }
  0xec   :  { %v251_v25 = vmul.f32 0.5, %v1332_v24 }
  0xee   :  { %v252_v27 = vadd.f32 0.5, %v251_v25 }
  0xf0   :  { %v256_v28 = vmul.f32 %v254_v26, %v252_v27 }
  0xf2   :  { %v258_v29 = vrot.slane %v256_v28, 4 }
  0xf4   :  { %v260_v30 = vadd.f32 %v258_v29, %v1483_v20 }
  0xf6   :  { %1333 = vtanh.f32 %v260_v30 }
 0x100   :  { %v1334_v32 = vpop.eup %1333 }
 0x101   :  { %v262_v33 = vsub.f32 0.0, %v1334_v32 }
 0x103   :  { %v264_v34 = vrot.slane %v262_v33, 2 }
 0x105   :  { %v266_v36 = vmul.f32 %v264_v34, %v252_v27 }
 0x107   :  { %v268_v37 = vrot.slane %v266_v36, 6 }
 0x109   :  { %v1495_v40 = vadd.f32 %v1334_v32, %v268_v37 }
 0x10b   :  { %v274_v41 = vrot.slane %v1495_v40, %v1490_v38  ;;  %v279_v42 = vrot.slane %v1495_v40, %v1493_v39 }
 0x10d   :  { %v310_v43 = vmul.f32 %v274_v41, %v1474_v11  ;;  %v311_v44 = vmul.f32 %v279_v42, %v1476_v12 }
 0x10f   :  { %v312_v45 = vadd.f32 %v311_v44, %v310_v43 }
 0x111   :  { %v313_v46 = vadd.f32 %v312_v45, %v1480_v17 }
 0x113   :  { %315 = vrot.lane.b32.xlu1 %v313_v46, %s1425_s1  ;;  %v323_v47 = vrot.slane %v313_v46, 4 }
 0x115   :  { %324 = vrot.lane.b32.xlu0 %v323_v47, %s1425_s1 }
 0x117   :  { %122 = vperm.xlu1 %1322, %v1285_v48  }
 0x119   :  { %126 = vperm.xlu0 %1321, %v1285_v48  }
 0x11b   :  { %140 = vperm.xlu1 %1322, %v1287_v49  }
 0x11d   :  { %144 = vperm.xlu0 %1321, %v1287_v49  }
 0x11f   :  { %133 = vperm.xlu1 %1322, %v1286_v50  }
 0x121   :  { %1323 = vset.pattern.permute.xlu0 %v1423_v5 }
 0x122   :  { %151 = vperm.xlu0 %1323, %v1288_v51  }
 0x126   :  { %1324 = vset.pattern.permute.xlu0 %v1424_v10 }
 0x185   :  { %v316_v52 = vpop.permute.xlu1 %315 }
 0x186   :  { %v318_v53 = vadd.f32 %v316_v52, %v1483_v20 }
 0x187   :  { %v325_v56 = vpop.permute.xlu0 %324 }
 0x188   :  { %v319_v54 = vmul.f32 0.5, %v318_v53 }
 0x18a   :  { %1335 = vtanh.f32 %v319_v54 }
 0x194   :  { %v1336_v55 = vpop.eup %1335 }
 0x195   :  { %v321_v57 = vmul.f32 0.5, %v1336_v55 }
 0x196   :  { %v1521_v58 = vpop.permute.xlu1 %122 }
 0x197   :  { %v322_v59 = vadd.f32 0.5, %v321_v57  ;;  %v275_v6 = vmul.f32 %v274_v41, %v1521_v58 }
 0x198   :  { %v1523_v60 = vpop.permute.xlu0 %126 }
 0x199   :  { %v327_v61 = vmul.f32 %v325_v56, %v322_v59  ;;  %v280_v0 = vmul.f32 %v279_v42, %v1523_v60 }
 0x19a   :  { %v1525_v62 = vpop.permute.xlu1 %140 }
 0x19b   :  { %v329_v63 = vrot.slane %v327_v61, 4  ;;  %v283_v3 = vmul.f32 0.0, %v1525_v62  ;;  %v281_v9 = vadd.f32 %v280_v0, %v275_v6 }
 0x19c   :  { %v1528_v1 = vpop.permute.xlu0 %144 }
 0x19d   :  { %v331_v2 = vadd.f32 %v329_v63, %v1483_v20  ;;  %v284_v4 = vmul.f32 0.0, %v1528_v1 }
 0x19e   :  { %v1534_v7 = vpop.permute.xlu1 %133 }
 0x19f   :  { %1337 = vtanh.f32 %v331_v2  ;;  %v285_v8 = vadd.f32 %v284_v4, %v283_v3  ;;  %v282_v14 = vadd.f32 %v281_v9, %v1534_v7 }
 0x1a1   :  { %v1536_v13 = vpop.permute.xlu0 %151 }
 0x1a2   :  { %v286_v15 = vadd.f32 %v285_v8, %v1536_v13 }
 0x1a4   :  { %v287_v16 = vadd.f32 %v286_v15, %v282_v14  ;;  %v293_v23 = vrot.slane %v286_v15, 4 }
 0x1a6   :  { %v288_v18 = vmul.f32 0.5, %v287_v16 }
 0x1a8   :  { %1339 = vtanh.f32 %v288_v18 }
 0x1a9   :  { %v1338_v19 = vpop.eup %1337 }
 0x1aa   :  { %334 = vrot.lane.b32.xlu1 %v1338_v19, %s1426_s9 }
 0x1b2   :  { %v1340_v21 = vpop.eup %1339 }
 0x1b3   :  { %v290_v22 = vmul.f32 0.5, %v1340_v21 }
 0x1b5   :  { %v291_v24 = vadd.f32 0.5, %v290_v22 }
 0x1b7   :  { %v295_v25 = vmul.f32 %v293_v23, %v291_v24 }
 0x1b9   :  { %v297_v26 = vrot.slane %v295_v25, 4 }
 0x1bb   :  { %v299_v27 = vadd.f32 %v297_v26, %v282_v14 }
 0x1bd   :  { %1341 = vtanh.f32 %v299_v27 }
 0x1c7   :  { %v1342_v28 = vpop.eup %1341 }
 0x1c8   :  { %v301_v29 = vsub.f32 0.0, %v1342_v28 }
 0x1ca   :  { %v303_v30 = vrot.slane %v301_v29, 2 }
 0x1cc   :  { %v305_v31 = vmul.f32 %v303_v30, %v291_v24 }
 0x1ce   :  { %v307_v32 = vrot.slane %v305_v31, 6 }
 0x1d0   :  { %v309_v33 = vadd.f32 %v1342_v28, %v307_v32 }
 0x1d2   :  { %v363_v34 = vrot.slane %v309_v33, %v1490_v38  ;;  %v368_v36 = vrot.slane %v309_v33, %v1493_v39 }
 0x1d4   :  { %v364_v37 = vmul.f32 %v363_v34, %v1525_v62  ;;  %v369_v41 = vmul.f32 %v368_v36, %v1528_v1 }
 0x1d6   :  { %v370_v42 = vadd.f32 %v369_v41, %v364_v37 }
 0x1d8   :  { %v371_v43 = vadd.f32 %v370_v42, %v1536_v13 }
 0x1da   :  { %373 = vrot.lane.b32.xlu0 %v371_v43, %s1425_s1  ;;  %v381_v47 = vrot.slane %v371_v43, 4 }
 0x21c   :  { %v335_v44 = vpop.permute.xlu1 %334 }
 0x21d   :  { %v337_v45 = vsub.f32 %v1495_v40, %v335_v44 }
 0x21f   :  { %v339_v46 = vrot.slane %v337_v45, 2 }
 0x221   :  { %340 = vrot.lane.b32.xlu1 %v339_v46, %s1425_s1 }
 0x225   :  { %382 = vrot.lane.b32.xlu1 %v381_v47, %s1425_s1 }
 0x24c   :  { %v374_v0 = vpop.permute.xlu0 %373 }
 0x293   :  { %v341_v48 = vpop.permute.xlu1 %340 }
 0x294   :  { %v343_v49 = vmul.f32 %v341_v48, %v322_v59 }
 0x296   :  { %v345_v50 = vrot.slane %v343_v49, 6 }
 0x297   :  { %v383_v14 = vpop.permute.xlu1 %382 }
 0x298   :  { %v347_v51 = vadd.f32 %v1338_v19, %v345_v50 }
 0x29a   :  { %v351_v52 = vrot.slane %v347_v51, %v1490_v38  ;;  %v356_v53 = vrot.slane %v347_v51, %v1493_v39 }
 0x29c   :  { %v352_v54 = vmul.f32 %v351_v52, %v1521_v58  ;;  %v357_v55 = vmul.f32 %v356_v53, %v1523_v60  ;;  %v406_v40 = vmul.f32 %v351_v52, %v1474_v11  ;;  %v407_v56 = vmul.f32 %v356_v53, %v1476_v12 }
 0x29e   :  { %v358_v57 = vadd.f32 %v357_v55, %v352_v54  ;;  %v408_v61 = vadd.f32 %v407_v56, %v406_v40 }
 0x2a0   :  { %v359_v63 = vadd.f32 %v358_v57, %v1534_v7  ;;  %v409_v59 = vadd.f32 %v408_v61, %v1480_v17 }
 0x2a2   :  { %v376_v2 = vadd.f32 %v374_v0, %v359_v63  ;;  %411 = vrot.lane.b32.xlu0 %v409_v59, %s1425_s1  ;;  %v419_v3 = vrot.slane %v409_v59, 4 }
 0x2a4   :  { %v377_v4 = vmul.f32 0.5, %v376_v2  ;;  %420 = vrot.lane.b32.xlu1 %v419_v3, %s1425_s1 }
 0x2a6   :  { %1343 = vtanh.f32 %v377_v4 }
 0x2b0   :  { %v1344_v6 = vpop.eup %1343 }
 0x2b1   :  { %v379_v8 = vmul.f32 0.5, %v1344_v6 }
 0x2b3   :  { %v380_v9 = vadd.f32 0.5, %v379_v8 }
 0x2b5   :  { %v385_v15 = vmul.f32 %v383_v14, %v380_v9 }
 0x2b7   :  { %v387_v16 = vrot.slane %v385_v15, 4 }
 0x2b9   :  { %v389_v18 = vadd.f32 %v387_v16, %v359_v63 }
 0x2bb   :  { %1345 = vtanh.f32 %v389_v18 }
 0x2c5   :  { %v1346_v19 = vpop.eup %1345 }
 0x2c6   :  { %392 = vrot.lane.b32.xlu0 %v1346_v19, %s1426_s9 }
 0x314   :  { %v412_v21 = vpop.permute.xlu0 %411 }
 0x315   :  { %v414_v22 = vadd.f32 %v412_v21, %v1483_v20 }
 0x316   :  { %v421_v27 = vpop.permute.xlu1 %420 }
 0x317   :  { %v415_v23 = vmul.f32 0.5, %v414_v22 }
 0x319   :  { %1347 = vtanh.f32 %v415_v23 }
 0x323   :  { %v1348_v24 = vpop.eup %1347 }
 0x324   :  { %v417_v25 = vmul.f32 0.5, %v1348_v24 }
 0x326   :  { %v418_v26 = vadd.f32 0.5, %v417_v25 }
 0x328   :  { %v423_v28 = vmul.f32 %v421_v27, %v418_v26 }
 0x32a   :  { %v425_v29 = vrot.slane %v423_v28, 4 }
 0x32c   :  { %v427_v30 = vadd.f32 %v425_v29, %v1483_v20 }
 0x32e   :  { %1349 = vtanh.f32 %v427_v30 }
 0x338   :  { %v1350_v31 = vpop.eup %1349  ;;  %v393_v32 = vpop.permute.xlu0 %392 }
 0x339   :  { %v395_v34 = vsub.f32 %v309_v33, %v393_v32  ;;  %430 = vrot.lane.b32.xlu1 %v1350_v31, %s1426_s9 }
 0x33b   :  { %v397_v36 = vrot.slane %v395_v34, 2 }
 0x33d   :  { %398 = vrot.lane.b32.xlu0 %v397_v36, %s1425_s1 }
 0x3ab   :  { %v431_v37 = vpop.permute.xlu1 %430 }
 0x3ac   :  { %v433_v41 = vsub.f32 %v347_v51, %v431_v37 }
 0x3ae   :  { %v435_v42 = vrot.slane %v433_v41, 2 }
 0x3af   :  { %v399_v43 = vpop.permute.xlu0 %398 }
 0x3b0   :  { %v401_v44 = vmul.f32 %v399_v43, %v380_v9  ;;  %436 = vrot.lane.b32.xlu1 %v435_v42, %s1425_s1 }
 0x3b2   :  { %v403_v45 = vrot.slane %v401_v44, 6 }
 0x3b4   :  { %v405_v46 = vadd.f32 %v1346_v19, %v403_v45 }
 0x3b6   :  { %v459_v47 = vrot.slane %v405_v46, %v1490_v38  ;;  %v464_v48 = vrot.slane %v405_v46, %v1493_v39 }
 0x3b8   :  { %v460_v33 = vmul.f32 %v459_v47, %v1525_v62  ;;  %v465_v49 = vmul.f32 %v464_v48, %v1528_v1 }
 0x3ba   :  { %v466_v50 = vadd.f32 %v465_v49, %v460_v33 }
 0x3bc   :  { %v467_v52 = vadd.f32 %v466_v50, %v1536_v13 }
 0x3be   :  { %469 = vrot.lane.b32.xlu0 %v467_v52, %s1425_s1  ;;  %v477_v51 = vrot.slane %v467_v52, 4 }
 0x3c0   :  { %478 = vrot.lane.b32.xlu1 %v477_v51, %s1425_s1 }
 0x422   :  { %v437_v53 = vpop.permute.xlu1 %436 }
 0x423   :  { %v439_v54 = vmul.f32 %v437_v53, %v418_v26 }
 0x425   :  { %v441_v55 = vrot.slane %v439_v54, 6 }
 0x427   :  { %v443_v40 = vadd.f32 %v1350_v31, %v441_v55 }
 0x429   :  { %v447_v56 = vrot.slane %v443_v40, %v1490_v38  ;;  %v452_v57 = vrot.slane %v443_v40, %v1493_v39 }
 0x42b   :  { %v448_v61 = vmul.f32 %v447_v56, %v1521_v58  ;;  %v453_v63 = vmul.f32 %v452_v57, %v1523_v60  ;;  %v502_v59 = vmul.f32 %v447_v56, %v1474_v11  ;;  %v503_v0 = vmul.f32 %v452_v57, %v1476_v12 }
 0x42d   :  { %v454_v2 = vadd.f32 %v453_v63, %v448_v61  ;;  %v504_v3 = vadd.f32 %v503_v0, %v502_v59 }
 0x42f   :  { %v455_v4 = vadd.f32 %v454_v2, %v1534_v7  ;;  %v505_v6 = vadd.f32 %v504_v3, %v1480_v17 }
 0x430   :  { %v470_v8 = vpop.permute.xlu0 %469 }
 0x431   :  { %v472_v9 = vadd.f32 %v470_v8, %v455_v4  ;;  %507 = vrot.lane.b32.xlu0 %v505_v6, %s1425_s1  ;;  %v515_v14 = vrot.slane %v505_v6, 4 }
 0x432   :  { %v479_v21 = vpop.permute.xlu1 %478 }
 0x433   :  { %v473_v15 = vmul.f32 0.5, %v472_v9  ;;  %516 = vrot.lane.b32.xlu1 %v515_v14, %s1425_s1 }
 0x435   :  { %1351 = vtanh.f32 %v473_v15 }
 0x43f   :  { %v1352_v16 = vpop.eup %1351 }
 0x440   :  { %v475_v18 = vmul.f32 0.5, %v1352_v16 }
 0x442   :  { %v476_v19 = vadd.f32 0.5, %v475_v18 }
 0x444   :  { %v481_v22 = vmul.f32 %v479_v21, %v476_v19 }
 0x446   :  { %v483_v23 = vrot.slane %v481_v22, 4 }
 0x448   :  { %v485_v24 = vadd.f32 %v483_v23, %v455_v4 }
 0x44a   :  { %1353 = vtanh.f32 %v485_v24 }
 0x454   :  { %v1354_v25 = vpop.eup %1353 }
 0x455   :  { %488 = vrot.lane.b32.xlu0 %v1354_v25, %s1426_s9 }
 0x4a3   :  { %v508_v26 = vpop.permute.xlu0 %507 }
 0x4a4   :  { %v510_v27 = vadd.f32 %v508_v26, %v1483_v20 }
 0x4a5   :  { %v517_v32 = vpop.permute.xlu1 %516 }
 0x4a6   :  { %v511_v28 = vmul.f32 0.5, %v510_v27 }
 0x4a8   :  { %1355 = vtanh.f32 %v511_v28 }
 0x4b2   :  { %v1356_v29 = vpop.eup %1355 }
 0x4b3   :  { %v513_v30 = vmul.f32 0.5, %v1356_v29 }
 0x4b5   :  { %v514_v31 = vadd.f32 0.5, %v513_v30 }
 0x4b7   :  { %v519_v34 = vmul.f32 %v517_v32, %v514_v31 }
 0x4b9   :  { %v521_v36 = vrot.slane %v519_v34, 4 }
 0x4bb   :  { %v523_v37 = vadd.f32 %v521_v36, %v1483_v20 }
 0x4bd   :  { %1357 = vtanh.f32 %v523_v37 }
 0x4c7   :  { %v1358_v41 = vpop.eup %1357  ;;  %v489_v42 = vpop.permute.xlu0 %488 }
 0x4c8   :  { %v491_v43 = vsub.f32 %v405_v46, %v489_v42  ;;  %526 = vrot.lane.b32.xlu1 %v1358_v41, %s1426_s9 }
 0x4ca   :  { %v493_v44 = vrot.slane %v491_v43, 2 }
 0x4cc   :  { %494 = vrot.lane.b32.xlu0 %v493_v44, %s1425_s1 }
 0x53a   :  { %v527_v45 = vpop.permute.xlu1 %526 }
 0x53b   :  { %v529_v47 = vsub.f32 %v443_v40, %v527_v45 }
 0x53d   :  { %v531_v48 = vrot.slane %v529_v47, 2 }
 0x53e   :  { %v495_v33 = vpop.permute.xlu0 %494 }
 0x53f   :  { %v497_v49 = vmul.f32 %v495_v33, %v476_v19  ;;  %532 = vrot.lane.b32.xlu1 %v531_v48, %s1425_s1 }
 0x541   :  { %v499_v50 = vrot.slane %v497_v49, 6 }
 0x543   :  { %v501_v52 = vadd.f32 %v1354_v25, %v499_v50 }
 0x545   :  { %v555_v51 = vrot.slane %v501_v52, %v1490_v38  ;;  %v560_v53 = vrot.slane %v501_v52, %v1493_v39 }
 0x547   :  { %v556_v46 = vmul.f32 %v555_v51, %v1525_v62  ;;  %v561_v54 = vmul.f32 %v560_v53, %v1528_v1 }
 0x549   :  { %v562_v55 = vadd.f32 %v561_v54, %v556_v46 }
 0x54b   :  { %v563_v56 = vadd.f32 %v562_v55, %v1536_v13 }
 0x54d   :  { %565 = vrot.lane.b32.xlu0 %v563_v56, %s1425_s1  ;;  %v573_v40 = vrot.slane %v563_v56, 4 }
 0x54f   :  { %574 = vrot.lane.b32.xlu1 %v573_v40, %s1425_s1 }
 0x5b1   :  { %v533_v57 = vpop.permute.xlu1 %532 }
 0x5b2   :  { %v535_v61 = vmul.f32 %v533_v57, %v514_v31 }
 0x5b4   :  { %v537_v63 = vrot.slane %v535_v61, 6 }
 0x5b6   :  { %v539_v59 = vadd.f32 %v1358_v41, %v537_v63 }
 0x5b8   :  { %v543_v0 = vrot.slane %v539_v59, %v1490_v38  ;;  %v548_v2 = vrot.slane %v539_v59, %v1493_v39 }
 0x5ba   :  { %v544_v3 = vmul.f32 %v543_v0, %v1521_v58  ;;  %v549_v4 = vmul.f32 %v548_v2, %v1523_v60  ;;  %v598_v6 = vmul.f32 %v543_v0, %v1474_v11  ;;  %v599_v8 = vmul.f32 %v548_v2, %v1476_v12 }
 0x5bc   :  { %v550_v9 = vadd.f32 %v549_v4, %v544_v3  ;;  %v600_v14 = vadd.f32 %v599_v8, %v598_v6 }
 0x5be   :  { %v551_v15 = vadd.f32 %v550_v9, %v1534_v7  ;;  %v601_v16 = vadd.f32 %v600_v14, %v1480_v17 }
 0x5bf   :  { %v566_v18 = vpop.permute.xlu0 %565 }
 0x5c0   :  { %v568_v19 = vadd.f32 %v566_v18, %v551_v15  ;;  %603 = vrot.lane.b32.xlu0 %v601_v16, %s1425_s1  ;;  %v611_v21 = vrot.slane %v601_v16, 4 }
 0x5c1   :  { %v575_v26 = vpop.permute.xlu1 %574 }
 0x5c2   :  { %v569_v22 = vmul.f32 0.5, %v568_v19  ;;  %612 = vrot.lane.b32.xlu1 %v611_v21, %s1425_s1 }
 0x5c4   :  { %1359 = vtanh.f32 %v569_v22 }
 0x5ce   :  { %v1360_v23 = vpop.eup %1359 }
 0x5cf   :  { %v571_v24 = vmul.f32 0.5, %v1360_v23 }
 0x5d1   :  { %v572_v25 = vadd.f32 0.5, %v571_v24 }
 0x5d3   :  { %v577_v27 = vmul.f32 %v575_v26, %v572_v25 }
 0x5d5   :  { %v579_v28 = vrot.slane %v577_v27, 4 }
 0x5d7   :  { %v581_v29 = vadd.f32 %v579_v28, %v551_v15 }
 0x5d9   :  { %1361 = vtanh.f32 %v581_v29 }
 0x5e3   :  { %v1362_v30 = vpop.eup %1361 }
 0x5e4   :  { %584 = vrot.lane.b32.xlu0 %v1362_v30, %s1426_s9 }
 0x632   :  { %v604_v31 = vpop.permute.xlu0 %603 }
 0x633   :  { %v606_v32 = vadd.f32 %v604_v31, %v1483_v20 }
 0x634   :  { %v613_v42 = vpop.permute.xlu1 %612 }
 0x635   :  { %v607_v34 = vmul.f32 0.5, %v606_v32 }
 0x637   :  { %1363 = vtanh.f32 %v607_v34 }
 0x641   :  { %v1364_v36 = vpop.eup %1363 }
 0x642   :  { %v609_v37 = vmul.f32 0.5, %v1364_v36 }
 0x644   :  { %v610_v41 = vadd.f32 0.5, %v609_v37 }
 0x646   :  { %v615_v43 = vmul.f32 %v613_v42, %v610_v41 }
 0x648   :  { %v617_v44 = vrot.slane %v615_v43, 4 }
 0x64a   :  { %v619_v45 = vadd.f32 %v617_v44, %v1483_v20 }
 0x64c   :  { %1365 = vtanh.f32 %v619_v45 }
 0x656   :  { %v1366_v47 = vpop.eup %1365  ;;  %v585_v48 = vpop.permute.xlu0 %584 }
 0x657   :  { %v587_v33 = vsub.f32 %v501_v52, %v585_v48  ;;  %622 = vrot.lane.b32.xlu1 %v1366_v47, %s1426_s9 }
 0x659   :  { %v589_v49 = vrot.slane %v587_v33, 2 }
 0x65b   :  { %590 = vrot.lane.b32.xlu0 %v589_v49, %s1425_s1 }
 0x6c9   :  { %v623_v50 = vpop.permute.xlu1 %622 }
 0x6ca   :  { %v625_v51 = vsub.f32 %v539_v59, %v623_v50 }
 0x6cc   :  { %v627_v53 = vrot.slane %v625_v51, 2 }
 0x6cd   :  { %v591_v46 = vpop.permute.xlu0 %590 }
 0x6ce   :  { %v593_v54 = vmul.f32 %v591_v46, %v572_v25  ;;  %628 = vrot.lane.b32.xlu1 %v627_v53, %s1425_s1 }
 0x6d0   :  { %v595_v55 = vrot.slane %v593_v54, 6 }
 0x6d2   :  { %v597_v56 = vadd.f32 %v1362_v30, %v595_v55 }
 0x6d4   :  { %v651_v40 = vrot.slane %v597_v56, %v1490_v38  ;;  %v656_v57 = vrot.slane %v597_v56, %v1493_v39 }
 0x6d6   :  { %v652_v52 = vmul.f32 %v651_v40, %v1525_v62  ;;  %v657_v61 = vmul.f32 %v656_v57, %v1528_v1 }
 0x6d8   :  { %v658_v63 = vadd.f32 %v657_v61, %v652_v52 }
 0x6da   :  { %v659_v0 = vadd.f32 %v658_v63, %v1536_v13 }
 0x6dc   :  { %661 = vrot.lane.b32.xlu0 %v659_v0, %s1425_s1  ;;  %v669_v59 = vrot.slane %v659_v0, 4 }
 0x6de   :  { %670 = vrot.lane.b32.xlu1 %v669_v59, %s1425_s1 }
 0x740   :  { %v629_v2 = vpop.permute.xlu1 %628 }
 0x741   :  { %v631_v3 = vmul.f32 %v629_v2, %v610_v41 }
 0x743   :  { %v633_v4 = vrot.slane %v631_v3, 6 }
 0x745   :  { %v635_v6 = vadd.f32 %v1366_v47, %v633_v4 }
 0x747   :  { %v639_v8 = vrot.slane %v635_v6, %v1490_v38  ;;  %v644_v9 = vrot.slane %v635_v6, %v1493_v39 }
 0x749   :  { %v640_v14 = vmul.f32 %v639_v8, %v1521_v58  ;;  %v645_v15 = vmul.f32 %v644_v9, %v1523_v60  ;;  %v694_v16 = vmul.f32 %v639_v8, %v1474_v11  ;;  %v695_v18 = vmul.f32 %v644_v9, %v1476_v12 }
 0x74b   :  { %v646_v19 = vadd.f32 %v645_v15, %v640_v14  ;;  %v696_v21 = vadd.f32 %v695_v18, %v694_v16 }
 0x74d   :  { %v647_v22 = vadd.f32 %v646_v19, %v1534_v7  ;;  %v697_v23 = vadd.f32 %v696_v21, %v1480_v17 }
 0x74e   :  { %v662_v24 = vpop.permute.xlu0 %661 }
 0x74f   :  { %v664_v25 = vadd.f32 %v662_v24, %v647_v22  ;;  %699 = vrot.lane.b32.xlu0 %v697_v23, %s1425_s1  ;;  %v707_v26 = vrot.slane %v697_v23, 4 }
 0x750   :  { %v671_v31 = vpop.permute.xlu1 %670 }
 0x751   :  { %v665_v27 = vmul.f32 0.5, %v664_v25  ;;  %708 = vrot.lane.b32.xlu1 %v707_v26, %s1425_s1 }
 0x753   :  { %1367 = vtanh.f32 %v665_v27 }
 0x75d   :  { %v1368_v28 = vpop.eup %1367 }
 0x75e   :  { %v667_v29 = vmul.f32 0.5, %v1368_v28 }
 0x760   :  { %v668_v30 = vadd.f32 0.5, %v667_v29 }
 0x762   :  { %v673_v32 = vmul.f32 %v671_v31, %v668_v30 }
 0x764   :  { %v675_v34 = vrot.slane %v673_v32, 4 }
 0x766   :  { %v677_v36 = vadd.f32 %v675_v34, %v647_v22 }
 0x768   :  { %1369 = vtanh.f32 %v677_v36 }
 0x772   :  { %v1370_v37 = vpop.eup %1369 }
 0x773   :  { %680 = vrot.lane.b32.xlu0 %v1370_v37, %s1426_s9 }
 0x7c1   :  { %v700_v41 = vpop.permute.xlu0 %699 }
 0x7c2   :  { %v702_v42 = vadd.f32 %v700_v41, %v1483_v20 }
 0x7c3   :  { %v709_v48 = vpop.permute.xlu1 %708 }
 0x7c4   :  { %v703_v43 = vmul.f32 0.5, %v702_v42 }
 0x7c6   :  { %1371 = vtanh.f32 %v703_v43 }
 0x7d0   :  { %v1372_v44 = vpop.eup %1371 }
 0x7d1   :  { %v705_v45 = vmul.f32 0.5, %v1372_v44 }
 0x7d3   :  { %v706_v47 = vadd.f32 0.5, %v705_v45 }
 0x7d5   :  { %v711_v33 = vmul.f32 %v709_v48, %v706_v47 }
 0x7d7   :  { %v713_v49 = vrot.slane %v711_v33, 4 }
 0x7d9   :  { %v715_v50 = vadd.f32 %v713_v49, %v1483_v20 }
 0x7db   :  { %1373 = vtanh.f32 %v715_v50 }
 0x7e5   :  { %v1374_v51 = vpop.eup %1373  ;;  %v681_v53 = vpop.permute.xlu0 %680 }
 0x7e6   :  { %v683_v46 = vsub.f32 %v597_v56, %v681_v53  ;;  %718 = vrot.lane.b32.xlu1 %v1374_v51, %s1426_s9 }
 0x7e8   :  { %v685_v54 = vrot.slane %v683_v46, 2 }
 0x7ea   :  { %686 = vrot.lane.b32.xlu0 %v685_v54, %s1425_s1 }
 0x858   :  { %v719_v55 = vpop.permute.xlu1 %718 }
 0x859   :  { %v721_v40 = vsub.f32 %v635_v6, %v719_v55 }
 0x85b   :  { %v723_v57 = vrot.slane %v721_v40, 2 }
 0x85c   :  { %v687_v52 = vpop.permute.xlu0 %686 }
 0x85d   :  { %v689_v61 = vmul.f32 %v687_v52, %v668_v30  ;;  %724 = vrot.lane.b32.xlu1 %v723_v57, %s1425_s1 }
 0x85f   :  { %v691_v63 = vrot.slane %v689_v61, 6 }
 0x861   :  { %v693_v0 = vadd.f32 %v1370_v37, %v691_v63 }
 0x863   :  { %v747_v59 = vrot.slane %v693_v0, %v1490_v38  ;;  %v752_v2 = vrot.slane %v693_v0, %v1493_v39 }
 0x865   :  { %v748_v56 = vmul.f32 %v747_v59, %v1525_v62  ;;  %v753_v3 = vmul.f32 %v752_v2, %v1528_v1 }
 0x867   :  { %v754_v4 = vadd.f32 %v753_v3, %v748_v56 }
 0x869   :  { %v755_v8 = vadd.f32 %v754_v4, %v1536_v13 }
 0x86b   :  { %757 = vrot.lane.b32.xlu0 %v755_v8, %s1425_s1  ;;  %v765_v6 = vrot.slane %v755_v8, 4 }
 0x86d   :  { %766 = vrot.lane.b32.xlu1 %v765_v6, %s1425_s1 }
 0x8cf   :  { %v725_v9 = vpop.permute.xlu1 %724 }
 0x8d0   :  { %v727_v14 = vmul.f32 %v725_v9, %v706_v47 }
 0x8d2   :  { %v729_v15 = vrot.slane %v727_v14, 6 }
 0x8d4   :  { %v731_v16 = vadd.f32 %v1374_v51, %v729_v15 }
 0x8d6   :  { %v735_v18 = vrot.slane %v731_v16, %v1490_v38  ;;  %v740_v19 = vrot.slane %v731_v16, %v1493_v39 }
 0x8d8   :  { %v736_v21 = vmul.f32 %v735_v18, %v1521_v58  ;;  %v741_v22 = vmul.f32 %v740_v19, %v1523_v60  ;;  %v790_v23 = vmul.f32 %v735_v18, %v1474_v11  ;;  %v791_v24 = vmul.f32 %v740_v19, %v1476_v12 }
 0x8da   :  { %v742_v25 = vadd.f32 %v741_v22, %v736_v21  ;;  %v792_v26 = vadd.f32 %v791_v24, %v790_v23 }
 0x8dc   :  { %v743_v27 = vadd.f32 %v742_v25, %v1534_v7  ;;  %v793_v28 = vadd.f32 %v792_v26, %v1480_v17 }
 0x8dd   :  { %v758_v29 = vpop.permute.xlu0 %757 }
 0x8de   :  { %v760_v30 = vadd.f32 %v758_v29, %v743_v27  ;;  %795 = vrot.lane.b32.xlu0 %v793_v28, %s1425_s1  ;;  %v803_v31 = vrot.slane %v793_v28, 4 }
 0x8df   :  { %v767_v41 = vpop.permute.xlu1 %766 }
 0x8e0   :  { %v761_v32 = vmul.f32 0.5, %v760_v30  ;;  %804 = vrot.lane.b32.xlu1 %v803_v31, %s1425_s1 }
 0x8e2   :  { %1375 = vtanh.f32 %v761_v32 }
 0x8ec   :  { %v1376_v34 = vpop.eup %1375 }
 0x8ed   :  { %v763_v36 = vmul.f32 0.5, %v1376_v34 }
 0x8ef   :  { %v764_v37 = vadd.f32 0.5, %v763_v36 }
 0x8f1   :  { %v769_v42 = vmul.f32 %v767_v41, %v764_v37 }
 0x8f3   :  { %v771_v43 = vrot.slane %v769_v42, 4 }
 0x8f5   :  { %v773_v44 = vadd.f32 %v771_v43, %v743_v27 }
 0x8f7   :  { %1377 = vtanh.f32 %v773_v44 }
 0x901   :  { %v1378_v45 = vpop.eup %1377 }
 0x902   :  { %776 = vrot.lane.b32.xlu0 %v1378_v45, %s1426_s9 }
 0x950   :  { %v796_v47 = vpop.permute.xlu0 %795 }
 0x951   :  { %v798_v48 = vadd.f32 %v796_v47, %v1483_v20 }
 0x952   :  { %v805_v53 = vpop.permute.xlu1 %804 }
 0x953   :  { %v799_v33 = vmul.f32 0.5, %v798_v48 }
 0x955   :  { %1379 = vtanh.f32 %v799_v33 }
 0x95f   :  { %v1380_v49 = vpop.eup %1379 }
 0x960   :  { %v801_v50 = vmul.f32 0.5, %v1380_v49 }
 0x962   :  { %v802_v51 = vadd.f32 0.5, %v801_v50 }
 0x964   :  { %v807_v46 = vmul.f32 %v805_v53, %v802_v51 }
 0x966   :  { %v809_v54 = vrot.slane %v807_v46, 4 }
 0x968   :  { %v811_v55 = vadd.f32 %v809_v54, %v1483_v20 }
 0x96a   :  { %1381 = vtanh.f32 %v811_v55 }
 0x974   :  { %v1382_v40 = vpop.eup %1381  ;;  %v777_v57 = vpop.permute.xlu0 %776 }
 0x975   :  { %v779_v52 = vsub.f32 %v693_v0, %v777_v57  ;;  %814 = vrot.lane.b32.xlu1 %v1382_v40, %s1426_s9 }
 0x977   :  { %v781_v61 = vrot.slane %v779_v52, 2 }
 0x979   :  { %782 = vrot.lane.b32.xlu0 %v781_v61, %s1425_s1 }
 0x9e7   :  { %v815_v63 = vpop.permute.xlu1 %814 }
 0x9e8   :  { %v817_v59 = vsub.f32 %v731_v16, %v815_v63 }
 0x9ea   :  { %v819_v2 = vrot.slane %v817_v59, 2 }
 0x9eb   :  { %v783_v56 = vpop.permute.xlu0 %782 }
 0x9ec   :  { %v785_v3 = vmul.f32 %v783_v56, %v764_v37  ;;  %820 = vrot.lane.b32.xlu1 %v819_v2, %s1425_s1 }
 0x9ee   :  { %v787_v4 = vrot.slane %v785_v3, 6 }
 0x9f0   :  { %v789_v8 = vadd.f32 %v1378_v45, %v787_v4 }
 0x9f2   :  { %v843_v6 = vrot.slane %v789_v8, %v1490_v38  ;;  %v848_v9 = vrot.slane %v789_v8, %v1493_v39 }
 0x9f4   :  { %v844_v0 = vmul.f32 %v843_v6, %v1525_v62  ;;  %v849_v14 = vmul.f32 %v848_v9, %v1528_v1 }
 0x9f6   :  { %v850_v15 = vadd.f32 %v849_v14, %v844_v0 }
 0x9f8   :  { %v851_v18 = vadd.f32 %v850_v15, %v1536_v13 }
 0x9fa   :  { %853 = vrot.lane.b32.xlu0 %v851_v18, %s1425_s1  ;;  %v861_v16 = vrot.slane %v851_v18, 4 }
 0x9fc   :  { %862 = vrot.lane.b32.xlu1 %v861_v16, %s1425_s1 }
 0xa5e   :  { %v821_v19 = vpop.permute.xlu1 %820 }
 0xa5f   :  { %v823_v21 = vmul.f32 %v821_v19, %v802_v51 }
 0xa61   :  { %v825_v22 = vrot.slane %v823_v21, 6  ;;  %v1289_v21 = vld [vmem:[%s1873_s2 + $0x18] sm:$0x3f] }
 0xa63   :  { %v827_v23 = vadd.f32 %v1382_v40, %v825_v22  ;;  %v1291_v22 = vld [vmem:[%s1873_s2 + $0x20] sm:$0x3f] }
 0xa65   :  { %v831_v24 = vrot.slane %v827_v23, %v1490_v38  ;;  %v836_v25 = vrot.slane %v827_v23, %v1493_v39 }
 0xa67   :  { %v832_v26 = vmul.f32 %v831_v24, %v1521_v58  ;;  %v837_v27 = vmul.f32 %v836_v25, %v1523_v60  ;;  %v886_v28 = vmul.f32 %v831_v24, %v1474_v11  ;;  %v887_v29 = vmul.f32 %v836_v25, %v1476_v12 }
 0xa69   :  { %v838_v30 = vadd.f32 %v837_v27, %v832_v26  ;;  %v888_v31 = vadd.f32 %v887_v29, %v886_v28 }
 0xa6b   :  { %v839_v32 = vadd.f32 %v838_v30, %v1534_v7  ;;  %v889_v34 = vadd.f32 %v888_v31, %v1480_v17 }
 0xa6c   :  { %v854_v36 = vpop.permute.xlu0 %853 }
 0xa6d   :  { %v856_v37 = vadd.f32 %v854_v36, %v839_v32  ;;  %891 = vrot.lane.b32.xlu0 %v889_v34, %s1425_s1  ;;  %v899_v41 = vrot.slane %v889_v34, 4 }
 0xa6e   :  { %v863_v45 = vpop.permute.xlu1 %862 }
 0xa6f   :  { %v857_v42 = vmul.f32 0.5, %v856_v37  ;;  %900 = vrot.lane.b32.xlu1 %v899_v41, %s1425_s1 }
 0xa71   :  { %1383 = vtanh.f32 %v857_v42 }
 0xa7b   :  { %v1384_v43 = vpop.eup %1383 }
 0xa7c   :  { %v859_v44 = vmul.f32 0.5, %v1384_v43 }
 0xa7e   :  { %v860_v11 = vadd.f32 0.5, %v859_v44 }
 0xa80   :  { %v865_v12 = vmul.f32 %v863_v45, %v860_v11 }
 0xa82   :  { %v867_v47 = vrot.slane %v865_v12, 4 }
 0xa84   :  { %v869_v48 = vadd.f32 %v867_v47, %v839_v32 }
 0xa86   :  { %1385 = vtanh.f32 %v869_v48 }
 0xa90   :  { %v1386_v33 = vpop.eup %1385 }
 0xa91   :  { %872 = vrot.lane.b32.xlu0 %v1386_v33, %s1426_s9 }
 0xadf   :  { %v892_v17 = vpop.permute.xlu0 %891 }
 0xae0   :  { %v894_v49 = vadd.f32 %v892_v17, %v1483_v20  ;;  %v1290_v17 = vld [vmem:[%s1874_s3 + $0x20] sm:$0x3f] }
 0xae1   :  { %v901_v54 = vpop.permute.xlu1 %900 }
 0xae2   :  { %v895_v50 = vmul.f32 0.5, %v894_v49  ;;  %v1295_v49 = vld [vmem:[%s1873_s2 + $0x30] sm:$0x3f] }
 0xae4   :  { %1387 = vtanh.f32 %v895_v50  ;;  %v1294_v50 = vld [vmem:[%s1874_s3 + $0x30] sm:$0x3f] }
 0xaee   :  { %v1388_v51 = vpop.eup %1387 }
 0xaef   :  { %v897_v53 = vmul.f32 0.5, %v1388_v51  ;;  %v1297_v51 = vld [vmem:[%s1873_s2 + $0x38] sm:$0x3f] }
 0xaf1   :  { %v898_v46 = vadd.f32 0.5, %v897_v53  ;;  %v1298_v53 = vld [vmem:[%s1874_s3 + $0x40] sm:$0x3f] }
 0xaf3   :  { %v903_v55 = vmul.f32 %v901_v54, %v898_v46 }
 0xaf5   :  { %v905_v40 = vrot.slane %v903_v55, 4 }
 0xaf7   :  { %v907_v57 = vadd.f32 %v905_v40, %v1483_v20  ;;  %v1750_v40 = vsub.s32 0, %v1487_v35 }
 0xaf9   :  { %1389 = vtanh.f32 %v907_v57  ;;  %v1753_v57 = vsub.s32 1, %v1487_v35 }
 0xb03   :  { %v1390_v52 = vpop.eup %1389  ;;  %v873_v61 = vpop.permute.xlu0 %872 }
 0xb04   :  { %v875_v63 = vsub.f32 %v789_v8, %v873_v61  ;;  %910 = vrot.lane.b32.xlu1 %v1390_v52, %s1426_s9  ;;  %v1762_v61 = vld [vmem:[%s1872_s0] sm:$0xff]  ;;  %s1427_s0 = smov 114  }
 0xb06   :  { %v877_v59 = vrot.slane %v875_v63, 2  ;;  %v985_v63 = vrot.slane %v1762_v61, %v1750_v40 }
 0xb08   :  { %878 = vrot.lane.b32.xlu0 %v877_v59, %s1425_s1  ;;  %v990_v59 = vrot.slane %v1762_v61, %v1753_v57 }
 0xb76   :  { %v911_v2 = vpop.permute.xlu1 %910 }
 0xb77   :  { %v913_v56 = vsub.f32 %v827_v23, %v911_v2 }
 0xb79   :  { %v915_v3 = vrot.slane %v913_v56, 2 }
 0xb7a   :  { %v879_v4 = vpop.permute.xlu0 %878 }
 0xb7b   :  { %v881_v6 = vmul.f32 %v879_v4, %v860_v11  ;;  %916 = vrot.lane.b32.xlu1 %v915_v3, %s1425_s1 }
 0xb7d   :  { %v883_v9 = vrot.slane %v881_v6, 6 }
 0xb7f   :  { %v1681_v0 = vadd.f32 %v1386_v33, %v883_v9 }
 0xb81   :  { %v939_v20 = vrot.slane %v1681_v0, %v1490_v38  ;;  %v944_v8 = vrot.slane %v1681_v0, %v1493_v39 }
 0xb83   :  { %v940_v14 = vmul.f32 %v939_v20, %v1525_v62  ;;  %v945_v15 = vmul.f32 %v944_v8, %v1528_v1  ;;  %v1292_v62 = vld [vmem:[%s1874_s3 + $0x28] sm:$0x3f] }
 0xb84   :  { %v1293_v1 = vld [vmem:[%s1873_s2 + $0x28] sm:$0x3f] }
 0xb85   :  { %v946_v18 = vadd.f32 %v945_v15, %v940_v14 }
 0xb87   :  { %v947_v16 = vadd.f32 %v946_v18, %v1536_v13 }
 0xb89   :  { %949 = vrot.lane.b32.xlu0 %v947_v16, %s1425_s1  ;;  %v957_v19 = vrot.slane %v947_v16, 4 }
 0xb8b   :  { %958 = vrot.lane.b32.xlu1 %v957_v19, %s1425_s1 }
 0xb8f   :  { %158 = vperm.xlu1 %1322, %v1289_v21  }
 0xb93   :  { %176 = vperm.xlu1 %1322, %v1291_v22  }
 0xb97   :  { %1325 = vset.pattern.permute.xlu1 %v1424_v10 }
 0xb98   :  { %180 = vperm.xlu1 %1325, %v1291_v22  }
 0xb9c   :  { %1327 = vset.pattern.permute.xlu1 %v1423_v5 }
 0xb9d   :  { %187 = vperm.xlu1 %1327, %v1292_v62  }
 0xba1   :  { %1328 = vset.pattern.permute.xlu1 %v1424_v10 }
 0xba2   :  { %198 = vperm.xlu1 %1328, %v1293_v1  }
 0xbed   :  { %v917_v13 = vpop.permute.xlu1 %916 }
 0xbee   :  { %v919_v23 = vmul.f32 %v917_v13, %v898_v46 }
 0xbf0   :  { %v921_v24 = vrot.slane %v919_v23, 6 }
 0xbf2   :  { %v1707_v25 = vadd.f32 %v1390_v52, %v921_v24  ;;  %v1296_v52 = vld [vmem:[%s1874_s3 + $0x38] sm:$0x3f] }
 0xbf4   :  { %v927_v26 = vrot.slane %v1707_v25, %v1490_v38  ;;  %v932_v27 = vrot.slane %v1707_v25, %v1493_v39 }
 0xbf6   :  { %v928_v28 = vmul.f32 %v927_v26, %v1521_v58  ;;  %v933_v29 = vmul.f32 %v932_v27, %v1523_v60 }
 0xbf8   :  { %v934_v30 = vadd.f32 %v933_v29, %v928_v28 }
 0xbfa   :  { %v935_v31 = vadd.f32 %v934_v30, %v1534_v7 }
 0xbfb   :  { %v950_v32 = vpop.permute.xlu0 %949 }
 0xbfc   :  { %v952_v34 = vadd.f32 %v950_v32, %v935_v31 }
 0xbfd   :  { %v959_v41 = vpop.permute.xlu1 %958 }
 0xbfe   :  { %v953_v36 = vmul.f32 0.5, %v952_v34 }
 0xc00   :  { %1391 = vtanh.f32 %v953_v36 }
 0xc0a   :  { %v1392_v37 = vpop.eup %1391 }
 0xc0b   :  { %v955_v42 = vmul.f32 0.5, %v1392_v37 }
 0xc0d   :  { %v1716_v43 = vadd.f32 0.5, %v955_v42 }
 0xc0e   :  { %v1718_v44 = vpop.permute.xlu1 %158 }
 0xc0f   :  { %v961_v11 = vmul.f32 %v959_v41, %v1716_v43  ;;  %v986_v2 = vmul.f32 %v985_v63, %v1718_v44 }
 0xc11   :  { %v963_v45 = vrot.slane %v961_v11, 4 }
 0xc12   :  { %v1721_v58 = vpop.permute.xlu1 %176 }
 0xc13   :  { %v965_v60 = vadd.f32 %v963_v45, %v935_v31  ;;  %v994_v7 = vmul.f32 %v927_v26, %v1721_v58 }
 0xc15   :  { %1393 = vtanh.f32 %v965_v60 }
 0xc17   :  { %v1723_v12 = vpop.permute.xlu1 %180 }
 0xc18   :  { %v995_v47 = vmul.f32 %v932_v27, %v1723_v12 }
 0xc1a   :  { %v996_v48 = vadd.f32 %v995_v47, %v994_v7 }
 0xc1f   :  { %v1727_v33 = vpop.eup %1393 }
 0xc20   :  { %968 = vrot.lane.b32.xlu0 %v1727_v33, %s1426_s9 }
 0xc24   :  { %162 = vperm.xlu0 %1324, %v1289_v21  }
 0xc28   :  { %1326 = vset.pattern.permute.xlu0 %v1423_v5 }
 0xc29   :  { %169 = vperm.xlu0 %1326, %v1290_v17  }
 0xc2d   :  { %194 = vperm.xlu0 %1326, %v1293_v1  }
 0xc31   :  { %212 = vperm.xlu0 %1326, %v1295_v49  }
 0xc35   :  { %205 = vperm.xlu0 %1326, %v1294_v50  }
 0xc39   :  { %230 = vperm.xlu0 %1326, %v1297_v51  }
 0xc3d   :  { %241 = vperm.xlu0 %1326, %v1298_v53  }
 0xc92   :  { %v969_v46 = vpop.permute.xlu0 %968 }
 0xc93   :  { %v971_v54 = vsub.f32 %v1681_v0, %v969_v46 }
 0xc95   :  { %v973_v55 = vrot.slane %v971_v54, 2 }
 0xc97   :  { %974 = vrot.lane.b32.xlu1 %v973_v55, %s1425_s1 }
 0xc9b   :  { %216 = vperm.xlu1 %1328, %v1295_v49  }
 0xc9f   :  { %1329 = vset.pattern.permute.xlu1 %v1423_v5  ;;  %v1773_v5 = vpop.permute.xlu1 %187 }
 0xca0   :  { %223 = vperm.xlu1 %1329, %v1296_v52   ;;  %v997_v6 = vadd.f32 %v996_v48, %v1773_v5 }
 0xca2   :  { %v1004_v15 = vrot.slane %v997_v6, 4 }
 0xca3   :  { %v1768_v35 = vpop.permute.xlu0 %162  ;;  %v1788_v30 = vpop.permute.xlu1 %198 }
 0xca4   :  { %v991_v56 = vmul.f32 %v990_v59, %v1768_v35  ;;  %1330 = vset.pattern.permute.xlu1 %v1424_v10 }
 0xca5   :  { %234 = vperm.xlu1 %1330, %v1297_v51  }
 0xca6   :  { %v992_v3 = vadd.f32 %v991_v56, %v986_v2 }
 0xca8   :  { %v1775_v4 = vpop.permute.xlu0 %169 }
 0xca9   :  { %v993_v9 = vadd.f32 %v992_v3, %v1775_v4 }
 0xcab   :  { %v998_v0 = vadd.f32 %v997_v6, %v993_v9 }
 0xcac   :  { %v1791_v34 = vpop.permute.xlu0 %194 }
 0xcad   :  { %v999_v20 = vmul.f32 0.5, %v998_v0 }
 0xcaf   :  { %1395 = vtanh.f32 %v999_v20 }
 0xcb0   :  { %v1794_v37 = vpop.permute.xlu0 %212 }
 0xcb4   :  { %v1804_v48 = vpop.permute.xlu0 %205 }
 0xcb9   :  { %v1396_v8 = vpop.eup %1395 }
 0xcba   :  { %v1001_v14 = vmul.f32 0.5, %v1396_v8  ;;  %v1810_v8 = vpop.permute.xlu0 %230 }
 0xcbc   :  { %v1002_v18 = vadd.f32 0.5, %v1001_v14 }
 0xcbe   :  { %v1006_v16 = vmul.f32 %v1004_v15, %v1002_v18 }
 0xcc0   :  { %v1008_v19 = vrot.slane %v1006_v16, 4 }
 0xcc2   :  { %v1010_v10 = vadd.f32 %v1008_v19, %v993_v9 }
 0xcc4   :  { %1397 = vtanh.f32 %v1010_v10 }
 0xcce   :  { %v1398_v21 = vpop.eup %1397 }
 0xccf   :  { %v1012_v22 = vsub.f32 %v1707_v25, %v1398_v21 }
 0xcd1   :  { %v1014_v62 = vrot.slane %v1012_v22, 2 }
 0xcd3   :  { %v1016_v1 = vmul.f32 %v1014_v62, %v1002_v18 }
 0xcd5   :  { %v1018_v13 = vrot.slane %v1016_v1, 6  ;;  %v1820_v1 = vpop.permute.xlu0 %241 }
 0xcd7   :  { %v1780_v23 = vadd.f32 %v1398_v21, %v1018_v13 }
 0xcd9   :  { %v1024_v24 = vrot.slane %v1780_v23, %v1490_v38  ;;  %v1029_v26 = vrot.slane %v1780_v23, %v1493_v39 }
 0xcdb   :  { %v1093_v27 = vmul.f32 %v1024_v24, %v1721_v58  ;;  %v1094_v28 = vmul.f32 %v1029_v26, %v1723_v12  ;;  %v1025_v42 = vmul.f32 %v1024_v24, %v1791_v34  ;;  %v1030_v11 = vmul.f32 %v1029_v26, %v1788_v30 }
 0xcdd   :  { %v1095_v29 = vadd.f32 %v1094_v28, %v1093_v27  ;;  %v1031_v47 = vadd.f32 %v1030_v11, %v1025_v42 }
 0xcdf   :  { %v1032_v49 = vadd.f32 %v1031_v47, %v1804_v48 }
 0xd09   :  { %v975_v31 = vpop.permute.xlu1 %974 }
 0xd0a   :  { %v977_v25 = vmul.f32 %v975_v31, %v1716_v43 }
 0xd0c   :  { %v979_v32 = vrot.slane %v977_v25, 6 }
 0xd0e   :  { %v981_v36 = vadd.f32 %v1727_v33, %v979_v32  ;;  %v1096_v32 = vadd.f32 %v1095_v29, %v1773_v5 }
 0xd10   :  { %v1036_v41 = vrot.slane %v981_v36, %v1490_v38  ;;  %v1041_v45 = vrot.slane %v981_v36, %v1493_v39 }
 0xd12   :  { %v1037_v43 = vmul.f32 %v1036_v41, %v1794_v37 }
 0xd1a   :  { %v1800_v60 = vpop.permute.xlu1 %216 }
 0xd1b   :  { %v1042_v7 = vmul.f32 %v1041_v45, %v1800_v60  ;;  %v1103_v45 = vrot.slane %v1096_v32, 4 }
 0xd1d   :  { %v1043_v33 = vadd.f32 %v1042_v7, %v1037_v43 }
 0xd1f   :  { %v1806_v17 = vpop.permute.xlu1 %223 }
 0xd20   :  { %v1044_v50 = vadd.f32 %v1043_v33, %v1806_v17 }
 0xd22   :  { %v1045_v51 = vadd.f32 %v1044_v50, %v1032_v49  ;;  %v1051_v52 = vrot.slane %v1044_v50, 4 }
 0xd24   :  { %v1046_v53 = vmul.f32 0.5, %v1045_v51  ;;  %v1812_v14 = vpop.permute.xlu1 %234 }
 0xd26   :  { %1399 = vtanh.f32 %v1046_v53 }
 0xd30   :  { %v1400_v46 = vpop.eup %1399 }
 0xd31   :  { %v1048_v54 = vmul.f32 0.5, %v1400_v46 }
 0xd33   :  { %v1049_v55 = vadd.f32 0.5, %v1048_v54 }
 0xd35   :  { %v1053_v63 = vmul.f32 %v1051_v52, %v1049_v55 }
 0xd37   :  { %v1055_v59 = vrot.slane %v1053_v63, 4 }
 0xd39   :  { %v1057_v2 = vadd.f32 %v1055_v59, %v1032_v49 }
 0xd3b   :  { %1401 = vtanh.f32 %v1057_v2 }
 0xd45   :  { %v1402_v56 = vpop.eup %1401 }
 0xd46   :  { %v1059_v3 = vsub.f32 %v981_v36, %v1402_v56 }
 0xd48   :  { %v1061_v6 = vrot.slane %v1059_v3, 2 }
 0xd4a   :  { %v1063_v9 = vmul.f32 %v1061_v6, %v1049_v55 }
 0xd4c   :  { %v1065_v0 = vrot.slane %v1063_v9, 6 }
 0xd4e   :  { %v1067_v20 = vadd.f32 %v1402_v56, %v1065_v0 }
 0xd50   :  { %v1071_v15 = vrot.slane %v1067_v20, %v1490_v38  ;;  %v1076_v18 = vrot.slane %v1067_v20, %v1493_v39 }
 0xd52   :  { %v1132_v16 = vmul.f32 %v1071_v15, %v1794_v37  ;;  %v1133_v19 = vmul.f32 %v1076_v18, %v1800_v60  ;;  %v1072_v10 = vmul.f32 %v1071_v15, %v1810_v8  ;;  %v1077_v21 = vmul.f32 %v1076_v18, %v1812_v14 }
 0xd54   :  { %v1134_v22 = vadd.f32 %v1133_v19, %v1132_v16  ;;  %v1078_v62 = vadd.f32 %v1077_v21, %v1072_v10 }
 0xd56   :  { %v1079_v13 = vadd.f32 %v1078_v62, %v1820_v1 }
 0xd58   :  { %v1824_v24 = vadd.f32 %v1762_v61, %v1079_v13 }
 0xd5a   :  { %v1084_v26 = vrot.slane %v1824_v24, %v1750_v40  ;;  %v1089_v27 = vrot.slane %v1824_v24, %v1753_v57 }
 0xd5c   :  { %v1085_v28 = vmul.f32 %v1084_v26, %v1718_v44  ;;  %v1090_v31 = vmul.f32 %v1089_v27, %v1768_v35 }
 0xd5e   :  { %v1091_v25 = vadd.f32 %v1090_v31, %v1085_v28 }
 0xd60   :  { %v1092_v36 = vadd.f32 %v1091_v25, %v1775_v4 }
 0xd62   :  { %v1097_v41 = vadd.f32 %v1096_v32, %v1092_v36 }
 0xd64   :  { %v1098_v42 = vmul.f32 0.5, %v1097_v41 }
 0xd66   :  { %1403 = vtanh.f32 %v1098_v42 }
 0xd70   :  { %v1404_v61 = vpop.eup %1403 }
 0xd71   :  { %v1100_v11 = vmul.f32 0.5, %v1404_v61 }
 0xd73   :  { %v1101_v7 = vadd.f32 0.5, %v1100_v11 }
 0xd75   :  { %v1105_v43 = vmul.f32 %v1103_v45, %v1101_v7 }
 0xd77   :  { %v1107_v47 = vrot.slane %v1105_v43, 4 }
 0xd79   :  { %v1109_v33 = vadd.f32 %v1107_v47, %v1092_v36 }
 0xd7b   :  { %1405 = vtanh.f32 %v1109_v33 }
 0xd85   :  { %v1406_v49 = vpop.eup %1405 }
 0xd86   :  { %v1111_v50 = vsub.f32 %v1780_v23, %v1406_v49  ;;  %v1135_v23 = vadd.f32 %v1134_v22, %v1806_v17 }
 0xd88   :  { %v1113_v51 = vrot.slane %v1111_v50, 2  ;;  %v1142_v16 = vrot.slane %v1135_v23, 4 }
 0xd8a   :  { %v1115_v53 = vmul.f32 %v1113_v51, %v1101_v7 }
 0xd8c   :  { %v1117_v46 = vrot.slane %v1115_v53, 6 }
 0xd8e   :  { %v1119_v29 = vadd.f32 %v1406_v49, %v1117_v46 }
 0xd90   :  { %v1123_v54 = vrot.slane %v1119_v29, %v1490_v38  ;;  %v1128_v55 = vrot.slane %v1119_v29, %v1493_v39 }
 0xd92   :  { %v1124_v52 = vmul.f32 %v1123_v54, %v1791_v34  ;;  %v1129_v63 = vmul.f32 %v1128_v55, %v1788_v30  ;;  %v1184_v59 = vmul.f32 %v1123_v54, %v1721_v58  ;;  %v1185_v2 = vmul.f32 %v1128_v55, %v1723_v12 }
 0xd94   :  { %v1130_v56 = vadd.f32 %v1129_v63, %v1124_v52  ;;  %v1186_v3 = vadd.f32 %v1185_v2, %v1184_v59 }
 0xd96   :  { %v1131_v6 = vadd.f32 %v1130_v56, %v1804_v48 }
 0xd98   :  { %v1136_v9 = vadd.f32 %v1135_v23, %v1131_v6 }
 0xd9a   :  { %v1137_v0 = vmul.f32 0.5, %v1136_v9 }
 0xd9c   :  { %1407 = vtanh.f32 %v1137_v0 }
 0xda6   :  { %v1408_v15 = vpop.eup %1407 }
 0xda7   :  { %v1139_v18 = vmul.f32 0.5, %v1408_v15 }
 0xda9   :  { %v1140_v19 = vadd.f32 0.5, %v1139_v18 }
 0xdab   :  { %v1144_v10 = vmul.f32 %v1142_v16, %v1140_v19 }
 0xdad   :  { %v1146_v21 = vrot.slane %v1144_v10, 4 }
 0xdaf   :  { %v1148_v62 = vadd.f32 %v1146_v21, %v1131_v6 }
 0xdb1   :  { %1409 = vtanh.f32 %v1148_v62 }
 0xdbb   :  { %v1410_v58 = vpop.eup %1409 }
 0xdbc   :  { %v1150_v13 = vsub.f32 %v1067_v20, %v1410_v58 }
 0xdbe   :  { %v1152_v12 = vrot.slane %v1150_v13, 2 }
 0xdc0   :  { %v1154_v26 = vmul.f32 %v1152_v12, %v1140_v19 }
 0xdc2   :  { %v1156_v27 = vrot.slane %v1154_v26, 6 }
 0xdc4   :  { %v1158_v28 = vadd.f32 %v1410_v58, %v1156_v27 }
 0xdc6   :  { %v1162_v22 = vrot.slane %v1158_v28, %v1490_v38  ;;  %v1167_v31 = vrot.slane %v1158_v28, %v1493_v39 }
 0xdc8   :  { %v1163_v25 = vmul.f32 %v1162_v22, %v1810_v8  ;;  %v1168_v32 = vmul.f32 %v1167_v31, %v1812_v14  ;;  %v1223_v36 = vmul.f32 %v1162_v22, %v1794_v37  ;;  %v1224_v41 = vmul.f32 %v1167_v31, %v1800_v60 }
 0xdc9   :  { %v1187_v37 = vadd.f32 %v1186_v3, %v1773_v5 }
 0xdca   :  { %v1169_v42 = vadd.f32 %v1168_v32, %v1163_v25  ;;  %v1225_v61 = vadd.f32 %v1224_v41, %v1223_v36 }
 0xdcb   :  { %v1194_v54 = vrot.slane %v1187_v37, 4 }
 0xdcc   :  { %v1170_v20 = vadd.f32 %v1169_v42, %v1820_v1  ;;  %v1226_v9 = vadd.f32 %v1225_v61, %v1806_v17 }
 0xdce   :  { %v1171_v11 = vadd.f32 %v1170_v20, %v1824_v24  ;;  %v1233_v19 = vrot.slane %v1226_v9, 4 }
 0xdd0   :  { %v1175_v45 = vrot.slane %v1171_v11, %v1750_v40  ;;  %v1180_v7 = vrot.slane %v1171_v11, %v1753_v57  ;;  %v1264_v32 = vrot.slane %v1171_v11, 6 }
 0xdd2   :  { %v1176_v43 = vmul.f32 %v1175_v45, %v1718_v44  ;;  %v1181_v47 = vmul.f32 %v1180_v7, %v1768_v35  ;;  %v1270_v41 = vsel %vm1269_vm2, %v1824_v24, %v1264_v32 }
 0xdd4   :  { %v1182_v33 = vadd.f32 %v1181_v47, %v1176_v43 }
 0xdd6   :  { %v1183_v49 = vadd.f32 %v1182_v33, %v1775_v4 }
 0xdd8   :  { %v1188_v60 = vadd.f32 %v1187_v37, %v1183_v49 }
 0xdda   :  { %v1189_v50 = vmul.f32 0.5, %v1188_v60 }
 0xddc   :  { %1411 = vtanh.f32 %v1189_v50 }
 0xde6   :  { %v1412_v51 = vpop.eup %1411 }
 0xde7   :  { %v1191_v53 = vmul.f32 0.5, %v1412_v51 }
 0xde9   :  { %v1192_v46 = vadd.f32 0.5, %v1191_v53 }
 0xdeb   :  { %v1196_v55 = vmul.f32 %v1194_v54, %v1192_v46 }
 0xded   :  { %v1198_v40 = vrot.slane %v1196_v55, 4 }
 0xdef   :  { %v1200_v52 = vadd.f32 %v1198_v40, %v1183_v49 }
 0xdf1   :  { %1413 = vtanh.f32 %v1200_v52 }
 0xdfb   :  { %v1414_v57 = vpop.eup %1413 }
 0xdfc   :  { %v1202_v44 = vsub.f32 %v1119_v29, %v1414_v57 }
 0xdfe   :  { %v1204_v63 = vrot.slane %v1202_v44, 2 }
 0xe00   :  { %v1206_v35 = vmul.f32 %v1204_v63, %v1192_v46 }
 0xe02   :  { %v1208_v59 = vrot.slane %v1206_v35, 6 }
 0xe04   :  { %v1210_v2 = vadd.f32 %v1414_v57, %v1208_v59 }
 0xe06   :  { %v1214_v4 = vrot.slane %v1210_v2, %v1490_v38  ;;  %v1219_v5 = vrot.slane %v1210_v2, %v1493_v39 }
 0xe08   :  { %v1215_v56 = vmul.f32 %v1214_v4, %v1791_v34  ;;  %v1220_v3 = vmul.f32 %v1219_v5, %v1788_v30 }
 0xe0a   :  { %v1221_v23 = vadd.f32 %v1220_v3, %v1215_v56 }
 0xe0c   :  { %v1222_v6 = vadd.f32 %v1221_v23, %v1804_v48 }
 0xe0e   :  { %v1227_v0 = vadd.f32 %v1226_v9, %v1222_v6 }
 0xe10   :  { %v1228_v15 = vmul.f32 0.5, %v1227_v0 }
 0xe12   :  { %1415 = vtanh.f32 %v1228_v15 }
 0xe1c   :  { %v1416_v29 = vpop.eup %1415 }
 0xe1d   :  { %v1230_v18 = vmul.f32 0.5, %v1416_v29 }
 0xe1f   :  { %v1231_v16 = vadd.f32 0.5, %v1230_v18 }
 0xe21   :  { %v1235_v10 = vmul.f32 %v1233_v19, %v1231_v16 }
 0xe23   :  { %v1237_v21 = vrot.slane %v1235_v10, 4 }
 0xe25   :  { %v1239_v62 = vadd.f32 %v1237_v21, %v1222_v6 }
 0xe27   :  { %1417 = vtanh.f32 %v1239_v62 }
 0xe31   :  { %v1418_v58 = vpop.eup %1417 }
 0xe32   :  { %v1241_v34 = vsub.f32 %v1158_v28, %v1418_v58 }
 0xe34   :  { %v1243_v13 = vrot.slane %v1241_v34, 2 }
 0xe36   :  { %v1245_v30 = vmul.f32 %v1243_v13, %v1231_v16 }
 0xe38   :  { %v1247_v12 = vrot.slane %v1245_v30, 6 }
 0xe3a   :  { %v1249_v26 = vadd.f32 %v1418_v58, %v1247_v12 }
 0xe3c   :  { %v1253_v48 = vrot.slane %v1249_v26, %v1490_v38  ;;  %v1258_v17 = vrot.slane %v1249_v26, %v1493_v39 }
 0xe3e   :  { %v1254_v27 = vmul.f32 %v1253_v48, %v1810_v8  ;;  %v1259_v22 = vmul.f32 %v1258_v17, %v1812_v14 }
 0xe40   :  { %v1260_v31 = vadd.f32 %v1259_v22, %v1254_v27 }
 0xe42   :  { %v1261_v25 = vadd.f32 %v1260_v31, %v1820_v1 }
 0xe44   :  { %v1262_v36 = vadd.f32 %v1261_v25, %v1171_v11 }
 0xe46   :  { %v1267_v28 = vrot.slane %v1262_v36, 4 }
 0xe48   :  { %v1272_v42 = vsel %vm1271_vm3, %v1270_v41, %v1267_v28 }
 0xe49   :  { %1274 = vrot.lane.b32.xlu1 %v1272_v42, %s1427_s0 }
 0xebb   :  { %v1275_v38 = vpop.permute.xlu1 %1274 }
 0xebc   :  { %1278 = vst.msk [vmem:[%s1876_s4] sm:$0x3f] %vm1277_vm4, %v1275_v38 }

</bundles_post_ra>
